<compile_context>
chip_gen: v5e
topology: v5e:2x2
jax: 0.10.0
libtpu: 0.0.40
codegen_flags: <defaults>
</compile_context>

<pallas_src>
import jax
import jax.numpy as jnp
from jax.experimental import pallas as pl
from jax.experimental.pallas import tpu as pltpu


def _round_up(x, m):
    return ((x + m - 1) // m) * m


def _lane_pad(n):
    return _round_up(max(int(n), 1), 128)


def _textcnn_kernel(x_ref,      # (TB, S + KH_max - 1, E) bf16  (seq zero-id padded)
                    wc_ref,     # (KH_max * E, CPAD)      bf16  fused im2col conv weights
                    bc_ref,     # (1, CPAD)               f32   fused conv bias
                    mask_ref,   # (S, CPAD)               f32   0 / -1e30 time-validity mask
                    wl_ref,     # (CPAD, OPAD)            bf16  fused classifier weight
                    bl_ref,     # (1, OPAD)               f32   classifier bias
                    out_ref,    # (TB, OPAD)              f32   lane-dense logits
                    xcol_ref):  # (TB, S, KH_max * E)     bf16  im2col scratch (VMEM)
    tb, s_pad, e = x_ref.shape
    s, cpad = mask_ref.shape
    kh_max = s_pad - s + 1

    # In-kernel im2col: write each shifted (TB, S, E) window into its lane slot.
    # Every lane of the scratch is overwritten each step -> no init required.
    for dh in range(kh_max):
        xcol_ref[:, :, dh * e:(dh + 1) * e] = x_ref[:, dh:dh + s, :]

    # Single MXU push: (TB*S, kh*E) @ (kh*E, CPAD) with f32 accumulation inside
    # the MXU (replaces kh_max shallow K=E pushes + VPU accumulate adds).
    xcol = xcol_ref[...].reshape(tb * s, kh_max * e)
    acc = jnp.dot(xcol, wc_ref[...], preferred_element_type=jnp.float32)

    # Mask invalid time positions per filter bank, then max over time (f32).
    scores = acc.reshape(tb, s, cpad) + mask_ref[...]       # broadcast (S, CPAD)
    pooled = jnp.max(scores, axis=1)                        # (TB, CPAD)

    # Bias + ReLU after the max (both monotone -> identical to PyTorch order).
    feats = jnp.maximum(pooled + bc_ref[...], 0.0)          # (TB, CPAD) f32

    # Fused classifier; lane-dense (TB, OPAD) f32 store (unmasked vst).
    out_ref[...] = jnp.dot(feats.astype(jnp.bfloat16), wl_ref[...],
                           preferred_element_type=jnp.float32) + bl_ref[...]


def cnn_forward(token_ids, embed_table, conv_params, linear_w, linear_b,
                kernel_heights, *, batch_tile=None):
    """token_ids: (B, S) int32.  Returns logits (B, output_size) f32."""
    kernel_heights = tuple(int(k) for k in kernel_heights)
    kh_max = max(kernel_heights)
    n_banks = len(kernel_heights)
    B, S = token_ids.shape
    E = embed_table.shape[1]
    C = conv_params[0][0].shape[-1]
    O = linear_w.shape[1]
    assert S >= kh_max, "sequence length must be >= largest conv kernel height"

    CPAD = _lane_pad(n_banks * C)               # fused conv channels, lane-padded
    OPAD = _lane_pad(O)                         # lane-dense output
    KSLOTS = kh_max * E                         # im2col contraction depth
    s_pad = S + kh_max - 1

    # ---- batch tile: >= ~4096 MXU rows per grid step, multiple of 8 ---------
    if batch_tile is None:
        TB = _round_up(max(1, 4096 // max(S, 1)), 8)
    else:
        TB = _round_up(max(1, int(batch_tile)), 8)
    TB = max(8, min(TB, 512, _round_up(B, 8)))
    B_pad = _round_up(B, TB)
    grid = (B_pad // TB,)

    # ---- glue outside the kernel (gather stays in XLA; no activation pad) ---
    ids = token_ids.astype(jnp.int32)
    if (B_pad - B) or (kh_max - 1):
        # Pad token ids (not the embedded activations): padded seq positions
        # only reach -1e30-masked outputs; padded batch rows are sliced off.
        ids = jnp.pad(ids, ((0, B_pad - B), (0, kh_max - 1)))
    x = jnp.take(embed_table.astype(jnp.bfloat16), ids, axis=0)    # (B_pad, s_pad, E) bf16

    # Fused, lane-padded im2col conv weights / bias / time-validity mask.
    wc = jnp.zeros((kh_max, E, CPAD), jnp.float32)
    bc = jnp.zeros((1, CPAD), jnp.float32)
    mask = jnp.zeros((S, CPAD), jnp.float32)
    pos = jnp.arange(S)
    for j, ((w, b), kh) in enumerate(zip(conv_params, kernel_heights)):
        c0 = j * C
        wc = wc.at[:kh, :, c0:c0 + C].set(w)                 # zero rows for dh >= kh
        bc = bc.at[:, c0:c0 + C].set(b.reshape(1, C))
        invalid = (pos > (S - kh))[:, None]                  # s > S - kh is invalid
        mask = mask.at[:, c0:c0 + C].set(
            jnp.broadcast_to(jnp.where(invalid, -1e30, 0.0), (S, C)))
    wc_flat = wc.reshape(KSLOTS, CPAD).astype(jnp.bfloat16)  # rows = dh*E + e

    # Fused, lane-padded classifier.
    wl = jnp.zeros((CPAD, OPAD), jnp.float32)
    wl = wl.at[:n_banks * C, :O].set(linear_w).astype(jnp.bfloat16)
    bl = jnp.zeros((1, OPAD), jnp.float32).at[:, :O].set(linear_b.reshape(1, O))

    # ---- VMEM budget -> scoped limit ----------------------------------------
    vmem_est = (
        2 * TB * s_pad * _lane_pad(E) * 2          # x tile (bf16), double-buffered
        + 2 * TB * OPAD * 4                        # out tile (f32), double-buffered
        + TB * S * _lane_pad(KSLOTS) * 2           # im2col scratch (bf16)
        + 2 * TB * S * CPAD * 4                    # matmul acc / scores (f32)
        + 2 * (KSLOTS * CPAD * 2 + CPAD * OPAD * 2 +
               S * CPAD * 4 + CPAD * 4 + OPAD * 4)  # resident constants
    )
    vmem_limit = int(min(64 * 1024 * 1024, max(32 * 1024 * 1024, 2 * vmem_est)))

    out = pl.pallas_call(
        _textcnn_kernel,
        out_shape=jax.ShapeDtypeStruct((B_pad, OPAD), jnp.float32),
        grid=grid,
        in_specs=[
            pl.BlockSpec((TB, s_pad, E), lambda i: (i, 0, 0)),
            pl.BlockSpec((KSLOTS, CPAD), lambda i: (0, 0)),
            pl.BlockSpec((1, CPAD), lambda i: (0, 0)),
            pl.BlockSpec((S, CPAD), lambda i: (0, 0)),
            pl.BlockSpec((CPAD, OPAD), lambda i: (0, 0)),
            pl.BlockSpec((1, OPAD), lambda i: (0, 0)),
        ],
        out_specs=pl.BlockSpec((TB, OPAD), lambda i: (i, 0)),
        scratch_shapes=[pltpu.VMEM((TB, S, KSLOTS), jnp.bfloat16)],
        compiler_params=pltpu.CompilerParams(
            dimension_semantics=("parallel",),
            vmem_limit_bytes=vmem_limit,
        ),
    )(x, wc_flat, bc, mask, wl, bl)
    return out[:B, :O]


def _reference_forward(token_ids, embed_table, conv_params, linear_w, linear_b,
                       kernel_heights):
    """Pure-JAX f32 reference matching the PyTorch module (eval mode)."""
    x = jnp.take(embed_table, token_ids, axis=0).astype(jnp.float32)    # (B,S,E)
    B, S, _ = x.shape
    feats = []
    for (w, b), kh in zip(conv_params, kernel_heights):
        s_out = S - kh + 1
        acc = jnp.zeros((B, s_out, w.shape[-1]), jnp.float32)
        for dh in range(kh):
            acc = acc + jnp.einsum("bse,ec->bsc", x[:, dh:dh + s_out, :], w[dh])
        feats.append(jnp.max(jax.nn.relu(acc + b), axis=1))
    all_out = jnp.concatenate(feats, axis=1)
    return all_out @ linear_w + linear_b


if __name__ == "__main__":
    # Small, module-consistent shapes.
    batch_size = 16
    seq_len = 16
    vocab_size = 50
    embedding_length = 32
    out_channels = 8
    kernel_heights = (3, 4, 5)
    output_size = 4

    key = jax.random.PRNGKey(0)
    k_tok, k_emb, k_c1, k_c2, k_c3, k_lw, k_lb = jax.random.split(key, 7)

    token_ids = jax.random.randint(k_tok, (batch_size, seq_len), 0, vocab_size,
                                   dtype=jnp.int32)
    embed_table = jax.random.normal(k_emb, (vocab_size, embedding_length),
                                    dtype=jnp.float32) * 0.1

    conv_params = []
    for kh, kc in zip(kernel_heights, (k_c1, k_c2, k_c3)):
        # PyTorch Conv2d weight (C_out, 1, kh, E) -> layout (kh, E, C_out)
        w = jax.random.normal(kc, (kh, embedding_length, out_channels),
                              dtype=jnp.float32) * 0.05
        b = jnp.full((1, out_channels), 0.01, dtype=jnp.float32)
        conv_params.append((w, b))

    linear_w = jax.random.normal(
        k_lw, (len(kernel_heights) * out_channels, output_size),
        dtype=jnp.float32) * 0.05
    linear_b = jax.random.normal(k_lb, (1, output_size), dtype=jnp.float32) * 0.01

    logits = cnn_forward(token_ids, embed_table, conv_params, linear_w,
                         linear_b, kernel_heights)
    jax.block_until_ready(logits)
    assert logits.shape == (batch_size, output_size)

    ref = _reference_forward(token_ids, embed_table, conv_params, linear_w,
                             linear_b, kernel_heights)
    err = float(jnp.max(jnp.abs(logits - ref)))
    assert err < 2e-2, f"kernel/reference mismatch, max abs err = {err}"

    print("KERNEL_OK")
</pallas_src>

<mosaic_0001>
module attributes {stable_mosaic.version = 11 : i64} {
  func.func @_textcnn_kernel(%arg0: i32, %arg1: memref<16x20x32xbf16, #tpu.memory_space<vmem>>, %arg2: memref<160x128xbf16, #tpu.memory_space<vmem>>, %arg3: memref<1x128xf32, #tpu.memory_space<vmem>>, %arg4: memref<16x128xf32, #tpu.memory_space<vmem>>, %arg5: memref<128x128xbf16, #tpu.memory_space<vmem>>, %arg6: memref<1x128xf32, #tpu.memory_space<vmem>>, %arg7: memref<16x128xf32, #tpu.memory_space<vmem>>, %arg8: memref<16x16x160xbf16, #tpu.memory_space<vmem>>) attributes {dimension_semantics = [#tpu.dimension_semantics<parallel>], iteration_bounds = array<i64: 1>, scalar_prefetch = 0 : i64, scratch_operands = 1 : i64, tpu.core_type = #tpu.core_type<tc>, window_params = [{transform_indices = @transform_0, window_bounds = array<i64: 16, 20, 32>}, {pipeline_mode = #tpu.pipeline_mode<synchronous>, transform_indices = @transform_1, window_bounds = array<i64: 160, 128>}, {pipeline_mode = #tpu.pipeline_mode<synchronous>, transform_indices = @transform_2, window_bounds = array<i64: 1, 128>}, {pipeline_mode = #tpu.pipeline_mode<synchronous>, transform_indices = @transform_3, window_bounds = array<i64: 16, 128>}, {pipeline_mode = #tpu.pipeline_mode<synchronous>, transform_indices = @transform_4, window_bounds = array<i64: 128, 128>}, {pipeline_mode = #tpu.pipeline_mode<synchronous>, transform_indices = @transform_5, window_bounds = array<i64: 1, 128>}, {transform_indices = @transform_6, window_bounds = array<i64: 16, 128>}]} {
    %c0 = arith.constant 0 : index
    %c0_0 = arith.constant 0 : index
    %c0_1 = arith.constant 0 : index
    %0 = vector.load %arg1[%c0, %c0_0, %c0_1] : memref<16x20x32xbf16, #tpu.memory_space<vmem>>, vector<16x16x32xbf16>
    %c0_2 = arith.constant 0 : index
    %c0_3 = arith.constant 0 : index
    %c0_4 = arith.constant 0 : index
    %1 = vector.load %arg8[%c0_2, %c0_3, %c0_4] : memref<16x16x160xbf16, #tpu.memory_space<vmem>>, vector<16x16x32xbf16>
    tpu.vector_store %arg8[%c0_2, %c0_3, %c0_4], %0 {strides = array<i32>} : memref<16x16x160xbf16, #tpu.memory_space<vmem>>, vector<16x16x32xbf16>,
    %c0_5 = arith.constant 0 : index
    %c1 = arith.constant 1 : index
    %c0_6 = arith.constant 0 : index
    %2 = vector.load %arg1[%c0_5, %c1, %c0_6] : memref<16x20x32xbf16, #tpu.memory_space<vmem>>, vector<16x16x32xbf16>
    %c0_7 = arith.constant 0 : index
    %c0_8 = arith.constant 0 : index
    %c32 = arith.constant 32 : index
    %3 = vector.load %arg8[%c0_7, %c0_8, %c32] : memref<16x16x160xbf16, #tpu.memory_space<vmem>>, vector<16x16x32xbf16>
    tpu.vector_store %arg8[%c0_7, %c0_8, %c32], %2 {strides = array<i32>} : memref<16x16x160xbf16, #tpu.memory_space<vmem>>, vector<16x16x32xbf16>,
    %c0_9 = arith.constant 0 : index
    %c2 = arith.constant 2 : index
    %c0_10 = arith.constant 0 : index
    %4 = vector.load %arg1[%c0_9, %c2, %c0_10] : memref<16x20x32xbf16, #tpu.memory_space<vmem>>, vector<16x16x32xbf16>
    %c0_11 = arith.constant 0 : index
    %c0_12 = arith.constant 0 : index
    %c64 = arith.constant 64 : index
    %5 = vector.load %arg8[%c0_11, %c0_12, %c64] : memref<16x16x160xbf16, #tpu.memory_space<vmem>>, vector<16x16x32xbf16>
    tpu.vector_store %arg8[%c0_11, %c0_12, %c64], %4 {strides = array<i32>} : memref<16x16x160xbf16, #tpu.memory_space<vmem>>, vector<16x16x32xbf16>,
    %c0_13 = arith.constant 0 : index
    %c3 = arith.constant 3 : index
    %c0_14 = arith.constant 0 : index
    %6 = vector.load %arg1[%c0_13, %c3, %c0_14] : memref<16x20x32xbf16, #tpu.memory_space<vmem>>, vector<16x16x32xbf16>
    %c0_15 = arith.constant 0 : index
    %c0_16 = arith.constant 0 : index
    %c96 = arith.constant 96 : index
    %7 = vector.load %arg8[%c0_15, %c0_16, %c96] : memref<16x16x160xbf16, #tpu.memory_space<vmem>>, vector<16x16x32xbf16>
    tpu.vector_store %arg8[%c0_15, %c0_16, %c96], %6 {strides = array<i32>} : memref<16x16x160xbf16, #tpu.memory_space<vmem>>, vector<16x16x32xbf16>,
    %c0_17 = arith.constant 0 : index
    %c4 = arith.constant 4 : index
    %c0_18 = arith.constant 0 : index
    %8 = vector.load %arg1[%c0_17, %c4, %c0_18] : memref<16x20x32xbf16, #tpu.memory_space<vmem>>, vector<16x16x32xbf16>
    %c0_19 = arith.constant 0 : index
    %c0_20 = arith.constant 0 : index
    %c128 = arith.constant 128 : index
    %9 = vector.load %arg8[%c0_19, %c0_20, %c128] : memref<16x16x160xbf16, #tpu.memory_space<vmem>>, vector<16x16x32xbf16>
    tpu.vector_store %arg8[%c0_19, %c0_20, %c128], %8 {strides = array<i32>} : memref<16x16x160xbf16, #tpu.memory_space<vmem>>, vector<16x16x32xbf16>,
    %c0_21 = arith.constant 0 : index
    %c0_22 = arith.constant 0 : index
    %c0_23 = arith.constant 0 : index
    %10 = vector.load %arg8[%c0_21, %c0_22, %c0_23] : memref<16x16x160xbf16, #tpu.memory_space<vmem>>, vector<16x16x160xbf16>
    %11 = vector.shape_cast %10 : vector<16x16x160xbf16> to vector<256x160xbf16>
    %c0_24 = arith.constant 0 : index
    %c0_25 = arith.constant 0 : index
    %12 = vector.load %arg2[%c0_24, %c0_25] : memref<160x128xbf16, #tpu.memory_space<vmem>>, vector<160x128xbf16>
    %cst = arith.constant dense<0.000000e+00> : vector<256x128xf32>
    %13 = tpu.matmul %11, %12, %cst {dimension_numbers = #tpu.dot_dimension_numbers<[1], [0], [0], [1], [0, 0, 1, 1], [], []>} : vector<256x160xbf16>, vector<160x128xbf16>, vector<256x128xf32> -> vector<256x128xf32>
    %14 = vector.shape_cast %13 : vector<256x128xf32> to vector<16x16x128xf32>
    %c0_26 = arith.constant 0 : index
    %c0_27 = arith.constant 0 : index
    %15 = vector.load %arg4[%c0_26, %c0_27] : memref<16x128xf32, #tpu.memory_space<vmem>>, vector<16x128xf32>
    %16 = vector.shape_cast %15 : vector<16x128xf32> to vector<1x16x128xf32>
    %17 = vector.broadcast %16 : vector<1x16x128xf32> to vector<16x16x128xf32>
    %18 = arith.addf %14, %17 : vector<16x16x128xf32>
    %cst_28 = arith.constant dense<0xFF800000> : vector<16x128xf32>
    %19 = vector.multi_reduction <maximumf>, %18, %cst_28 [1] : vector<16x16x128xf32> to vector<16x128xf32>
    %c0_29 = arith.constant 0 : index
    %c0_30 = arith.constant 0 : index
    %20 = vector.load %arg3[%c0_29, %c0_30] : memref<1x128xf32, #tpu.memory_space<vmem>>, vector<1x128xf32>
    %21 = vector.broadcast %20 : vector<1x128xf32> to vector<16x128xf32>
    %22 = arith.addf %19, %21 : vector<16x128xf32>
    %cst_31 = arith.constant 0.000000e+00 : f32
    %23 = vector.broadcast %cst_31 : f32 to vector<16x128xf32>
    %24 = arith.maximumf %22, %23 : vector<16x128xf32>
    %25 = arith.truncf %24 : vector<16x128xf32> to vector<16x128xbf16>
    %c0_32 = arith.constant 0 : index
    %c0_33 = arith.constant 0 : index
    %26 = vector.load %arg5[%c0_32, %c0_33] : memref<128x128xbf16, #tpu.memory_space<vmem>>, vector<128x128xbf16>
    %cst_34 = arith.constant dense<0.000000e+00> : vector<16x128xf32>
    %27 = tpu.matmul %25, %26, %cst_34 {dimension_numbers = #tpu.dot_dimension_numbers<[1], [0], [0], [1], [0, 0, 1, 1], [], []>} : vector<16x128xbf16>, vector<128x128xbf16>, vector<16x128xf32> -> vector<16x128xf32>
    %c0_35 = arith.constant 0 : index
    %c0_36 = arith.constant 0 : index
    %28 = vector.load %arg6[%c0_35, %c0_36] : memref<1x128xf32, #tpu.memory_space<vmem>>, vector<1x128xf32>
    %29 = vector.broadcast %28 : vector<1x128xf32> to vector<16x128xf32>
    %30 = arith.addf %27, %29 : vector<16x128xf32>
    %c0_37 = arith.constant 0 : index
    %c0_38 = arith.constant 0 : index
    %31 = vector.load %arg7[%c0_37, %c0_38] : memref<16x128xf32, #tpu.memory_space<vmem>>, vector<16x128xf32>
    tpu.vector_store %arg7[%c0_37, %c0_38], %30 {strides = array<i32>} : memref<16x128xf32, #tpu.memory_space<vmem>>, vector<16x128xf32>,
    return
  }
  func.func @transform_0(%arg0: i32) -> (i32, i32, i32) {
    %c0_i32 = arith.constant 0 : i32
    %c0_i32_0 = arith.constant 0 : i32
    %c0_i32_1 = arith.constant 0 : i32
    return %arg0, %c0_i32, %c0_i32_0 : i32, i32, i32
  }
  func.func @transform_1(%arg0: i32) -> (i32, i32) {
    %c0_i32 = arith.constant 0 : i32
    %c0_i32_0 = arith.constant 0 : i32
    %c0_i32_1 = arith.constant 0 : i32
    return %c0_i32, %c0_i32_0 : i32, i32
  }
  func.func @transform_2(%arg0: i32) -> (i32, i32) {
    %c0_i32 = arith.constant 0 : i32
    %c0_i32_0 = arith.constant 0 : i32
    %c0_i32_1 = arith.constant 0 : i32
    return %c0_i32, %c0_i32_0 : i32, i32
  }
  func.func @transform_3(%arg0: i32) -> (i32, i32) {
    %c0_i32 = arith.constant 0 : i32
    %c0_i32_0 = arith.constant 0 : i32
    %c0_i32_1 = arith.constant 0 : i32
    return %c0_i32, %c0_i32_0 : i32, i32
  }
  func.func @transform_4(%arg0: i32) -> (i32, i32) {
    %c0_i32 = arith.constant 0 : i32
    %c0_i32_0 = arith.constant 0 : i32
    %c0_i32_1 = arith.constant 0 : i32
    return %c0_i32, %c0_i32_0 : i32, i32
  }
  func.func @transform_5(%arg0: i32) -> (i32, i32) {
    %c0_i32 = arith.constant 0 : i32
    %c0_i32_0 = arith.constant 0 : i32
    %c0_i32_1 = arith.constant 0 : i32
    return %c0_i32, %c0_i32_0 : i32, i32
  }
  func.func @transform_6(%arg0: i32) -> (i32, i32) {
    %c0_i32 = arith.constant 0 : i32
    %c0_i32_0 = arith.constant 0 : i32
    return %arg0, %c0_i32 : i32, i32
  }
}

</mosaic_0001>

<bundles_post_ra>
// kernel: tpu_custom_call.1
= control target key start
LH: loop header
LB: loop body
LE: loop exit
PB: predicated region body
PF: predicated region fallthrough
CT: control target
= control target key end

     0   :  { %vm138_vm0 = vsmask.f32 3328  ;;  %vm139_vm1 = vsmask.f32 7440  ;;  %vm750_vm2 = vcmask 1042432   ;;  %vm751_vm3 = vcmask 1046532   ;;  %s4793_s0 = inlined_call_operand.vmem [shape: bf16[16,20,32], index: 0, kind: input, shape index: {}]   ;;  %s4794_s1 = inlined_call_operand.vmem [shape: bf16[160,128], index: 1, kind: input, shape index: {}]   ;;  %s4795_s2 = inlined_call_operand.vmem [shape: f32[1,128], index: 2, kind: input, shape index: {}]   ;;  %s4796_s3 = inlined_call_operand.vmem [shape: f32[16,128], index: 3, kind: input, shape index: {}]   ;;  %s4797_s4 = inlined_call_operand.vmem [shape: bf16[128,128], index: 4, kind: input, shape index: {}]   ;;  %s4798_s5 = inlined_call_operand.vmem [shape: f32[1,128], index: 5, kind: input, shape index: {}]   ;;  %s4799_s6 = inlined_call_operand.hbm [shape: f32[16,128], index: 6, kind: output, shape index: {}]  }
   0x1   :  { %v114_v0 = vld [vmem:[%s4793_s0 + $0x60] sm:$0xf]  ;;  %v115_v1 = vld [vmem:[%s4793_s0 + $0x64] sm:$0xf]  ;;  %v3038_v11 = vld [vmem:[%s4794_s1 + $0x48] sm:$0xff]  ;;  %vm57_vm6 = vcmask 257024  }
   0x2   :  { %v334_v2 = vshrl.u32 %v114_v0, 16  ;;  %v337_v3 = vshll.u32 %v114_v0, 16  ;;  %v343_v4 = vshll.u32 %v115_v1, 16  ;;  %v347_v5 = vshrl.u32 %v115_v1, 16  ;;  %v678_v6 = vld [vmem:[%s4793_s0 + $0x60] sm:$0xe]  ;;  %vm3147_vm4 = vmor %vm750_vm2, %vm751_vm3  ;;  %2297 = vmatpush.bf16.msra.mxu1 %v3038_v11  ;;  %3055 = vmatpush.bf16.msra.mxu2 %v3038_v11 }
   0x3   :  { %v679_v7 = vld [vmem:[%s4793_s0 + $0x64] sm:$0xf]  ;;  %v2757_v14 = vrot.slane %v678_v6, 9  ;;  %v116_v16 = vld [vmem:[%s4793_s0 + $0x68] sm:$0x1]  ;;  %vm3165_vm5 = vmor %vm138_vm0, %vm139_vm1  ;;  %s3091_s19 = smov 64  }
   0x4   :  { %v336_v8 = vrot.slane %v334_v2, 4  ;;  %v339_v9 = vrot.slane %v337_v3, 5  ;;  %v345_v10 = vrot.slane %v343_v4, 5  ;;  %v349_v12 = vrot.slane %v347_v5, 4  ;;  %v680_v19 = vld [vmem:[%s4793_s0 + $0x68] sm:$0x1] }
   0x5   :  { %v811_v15 = vrot.slane %v679_v7, 5  ;;  %v353_v18 = vshll.u32 %v116_v16, 16  ;;  %v3037_v20 = vld [vmem:[%s4794_s1 + $0x40] sm:$0xff]  ;;  %v1624_v26 = vld [vmem:[%s4793_s0 + $0x8] sm:$0x3]  ;;  %vm1718_vm7 = vcmask 1041408  }
   0x6   :  { %v340_v17 = vor.u32 %v339_v9, %v336_v8  ;;  %v1622_v21 = vld [vmem:[%s4793_s0] sm:$0xc]  ;;  %v350_v24 = vor.u32 %v349_v12, %v345_v10  ;;  %v1623_v25 = vld [vmem:[%s4793_s0 + $0x4] sm:$0xf]  ;;  %vm1719_vm8 = vcmask 1045508   ;;  %v814_v31 = vrot.slane %v680_v19, 5  ;;  %2298 = vmatpush.bf16.msra.mxu1 %v3037_v20  ;;  %3056 = vmatpush.bf16.msra.mxu2 %v3037_v20 }
   0x7   :  { %v812_v23 = vsel %vm3147_vm4, %v2757_v14, %v811_v15  ;;  %v813_v28 = vrot.slane %v811_v15, 4  ;;  %v90_v29 = vld [vmem:[%s4793_s0] sm:$0xf]  ;;  %v355_v30 = vrot.slane %v353_v18, 5  ;;  %vm3181_vm9 = vmor %vm1718_vm7, %vm1719_vm8  ;;  %v2765_v33 = vrot.slane %v1622_v21, 10  ;;  %s3092_s26 = smov 32  }
   0x8   :  { %v341_v27 = vrot.slane %v340_v17, 4  ;;  %897 = vrot.lane.b32.xlu1 %v812_v23, %s3091_s19  ;;  %v1723_v34 = vrot.slane %v1623_v25, 6  ;;  %v91_v35 = vld [vmem:[%s4793_s0 + $0x4] sm:$0xf]  ;;  %v351_v37 = vrot.slane %v350_v24, 4  ;;  %v1726_v38 = vrot.slane %v1624_v26, 6 }
   0x9   :  { %v142_v39 = vshrl.u32 %v90_v29, 16  ;;  %v92_v40 = vld [vmem:[%s4793_s0 + $0x8] sm:$0x1]  ;;  %v145_v43 = vshll.u32 %v90_v29, 16  ;;  %v151_v45 = vshll.u32 %v91_v35, 16  ;;  %v155_v46 = vshrl.u32 %v91_v35, 16 }
   0xa   :  { %v346_v36 = vsel %vm3165_vm5, %v341_v27, %v345_v10  ;;  %v1724_v41 = vsel %vm3181_vm9, %v2765_v33, %v1723_v34  ;;  %v1725_v42 = vrot.slane %v1723_v34, 4  ;;  %v161_v47 = vshll.u32 %v92_v40, 16  ;;  %v3204_v51 = vld [vmem:[%s4793_s0 + $0x4] sm:$0xf]  ;;  %v1018_v52 = vld [vmem:[%s4793_s0 + $0x60] sm:$0xe] }
   0xb   :  { %557 = vrot.lane.b32.xlu0 %v346_v36, %s3092_s26  ;;  %1865 = vst.msk [vmem:[#allocation2 + $0x4] sm:$0xf] %vm57_vm6, %v1724_v41  ;;  %v144_v44 = vrot.slane %v142_v39, 4  ;;  %v815_v48 = vsel %vm3147_vm4, %v813_v28, %v814_v31  ;;  %vm2153_vm10 = vcmask 261120   ;;  %v147_v50 = vrot.slane %v145_v43, 5  ;;  %s3093_s29 = smov 96  }
   0xc   :  { %v1727_v49 = vsel %vm3181_vm9, %v1725_v42, %v1726_v38  ;;  %v356_v53 = vsel %vm3165_vm5, %v351_v37, %v355_v30  ;;  %v3212_v54 = vrot.slane %v151_v45, 5  ;;  %v157_v55 = vrot.slane %v155_v46, 4  ;;  %v1019_v59 = vld [vmem:[%s4793_s0 + $0x64] sm:$0xf]  ;;  %v994_v0 = vld [vmem:[%s4793_s0] sm:$0xe] }
   0xd   :  { %1866 = vst.msk [vmem:[#allocation2 + $0xc] sm:$0xf] %vm57_vm6, %v1727_v49  ;;  %v1270_v56 = vshrl.u32 %v1018_v52, 16  ;;  %v148_v57 = vor.u32 %v147_v50, %v144_v44  ;;  %v163_v58 = vrot.slane %v161_v47, 5  ;;  %vm1042_vm11 = vsmask.f32 2304 }
   0xe   :  { %v1273_v60 = vshll.u32 %v1018_v52, 16  ;;  %v158_v61 = vor.u32 %v157_v55, %v3212_v54  ;;  %vm1043_vm12 = vsmask.f32 6416  ;;  %v1279_v63 = vshrl.u32 %v1019_v59, 16  ;;  %v995_v5 = vld [vmem:[%s4793_s0 + $0x4] sm:$0xf] }
   0xf   :  { %v1272_v62 = vrot.slane %v1270_v56, 5  ;;  %v149_v1 = vrot.slane %v148_v57, 4  ;;  %v755_v2 = vrot.slane %v3204_v51, 5  ;;  %v1282_v4 = vshll.u32 %v1019_v59, 16  ;;  %v1625_v10 = vld [vmem:[%s4793_s0 + $0xc] sm:$0xc]  ;;  %vm3237_vm13 = vmor %vm1042_vm11, %vm1043_vm12 }
  0x10   :  { %899 = vrot.lane.b32.xlu1 %v815_v48, %s3091_s19  ;;  %v1275_v3 = vrot.slane %v1273_v60, 6  ;;  %v159_v6 = vrot.slane %v158_v61, 4  ;;  %v1281_v7 = vrot.slane %v1279_v63, 5  ;;  %v1046_v8 = vshrl.u32 %v994_v0, 16  ;;  %v1626_v16 = vld [vmem:[%s4793_s0 + $0x10] sm:$0xf] }
  0x11   :  { %v1049_v9 = vshll.u32 %v994_v0, 16  ;;  %v1284_v14 = vrot.slane %v1282_v4, 6  ;;  %v1055_v15 = vshrl.u32 %v995_v5, 16  ;;  %v1058_v21 = vshll.u32 %v995_v5, 16  ;;  %v1627_v23 = vld [vmem:[%s4793_s0 + $0x14] sm:$0x3] }
  0x12   :  { %v2997_v11 = vld [vmem:[#allocation2 + $0x4] sm:$0xf]  ;;  %v1276_v12 = vor.u32 %v1275_v3, %v1272_v62  ;;  %v164_v17 = vsel %vm3165_vm5, %v159_v6, %v163_v58  ;;  %v1048_v19 = vrot.slane %v1046_v8, 5  ;;  %v2766_v28 = vrot.slane %v1625_v10, 10  ;;  %v117_v34 = vld [vmem:[%s4793_s0 + $0x6c] sm:$0xf] }
  0x13   :  { %559 = vrot.lane.b32.xlu0 %v356_v53, %s3092_s26  ;;  %v1051_v20 = vrot.slane %v1049_v9, 6  ;;  %v3244_v26 = vor.u32 %v1284_v14, %v1281_v7  ;;  %v1057_v27 = vrot.slane %v1055_v15, 5  ;;  %v1060_v31 = vrot.slane %v1058_v21, 6  ;;  %v118_v35 = vld [vmem:[%s4793_s0 + $0x70] sm:$0xf] }
  0x14   :  { %v2785_v24 = vld [vmem:[#allocation2 + $0x8] sm:$0xf0]  ;;  %v1277_v25 = vrot.slane %v1276_v12, 4  ;;  %v1730_v33 = vrot.slane %v1626_v16, 6  ;;  %v1733_v37 = vrot.slane %v1627_v23, 6  ;;  %v358_v38 = vshrl.u32 %v117_v34, 16 }
  0x15   :  { %v2788_v29 = vor.u32 %v2997_v11, %v2785_v24  ;;  %v1052_v30 = vor.u32 %v1051_v20, %v1048_v19  ;;  %v361_v39 = vshll.u32 %v117_v34, 16  ;;  %v1020_v40 = vld [vmem:[%s4793_s0 + $0x68] sm:$0x3]  ;;  %v154_v41 = vsel %vm3165_vm5, %v149_v1, %v3212_v54  ;;  %v119_v49 = vld [vmem:[%s4793_s0 + $0x74] sm:$0x1] }
  0x16   :  { %v1286_v36 = vsel %vm3237_vm13, %v1277_v25, %v3244_v26  ;;  %v656_v42 = vld [vmem:[%s4793_s0 + $0x8] sm:$0x1]  ;;  %v1731_v44 = vsel %vm3181_vm9, %v2766_v28, %v1730_v33  ;;  %v1732_v45 = vrot.slane %v1730_v33, 4  ;;  %v3269_v46 = vor.u32 %v1060_v31, %v1057_v27  ;;  %v1021_v62 = vld [vmem:[%s4793_s0 + $0x6c] sm:$0xe] }
  0x17   :  { %2949 = vmatmul.msk.bf16.vlgmr.msra.gmra.mxu1 %vm2153_vm10, %v2788_v29  ;;  %v1053_v43 = vrot.slane %v1052_v30, 4  ;;  %1525 = vrot.lane.b32.xlu2 %v1286_v36, %s3093_s29  ;;  %1867 = vst.msk [vmem:[#allocation2 + $0x14] sm:$0xf] %vm57_vm6, %v1731_v44  ;;  %v367_v47 = vshll.u32 %v118_v35, 16  ;;  %v371_v48 = vshrl.u32 %v118_v35, 16  ;;  %v360_v52 = vrot.slane %v358_v38, 4 }
  0x18   :  { %527 = vrot.lane.b32.xlu1 %v164_v17, %s3092_s26  ;;  %v1734_v50 = vsel %vm3181_vm9, %v1732_v45, %v1733_v37  ;;  %v1289_v53 = vshrl.u32 %v1020_v40, 16  ;;  %v363_v54 = vrot.slane %v361_v39, 5  ;;  %v1292_v56 = vshll.u32 %v1020_v40, 16  ;;  %v3294_v4 = vld [vmem:[%s4793_s0 + $0x70] sm:$0xf] }
  0x19   :  { %1868 = vst.msk [vmem:[#allocation2 + $0x1c] sm:$0xf] %vm57_vm6, %v1734_v50  ;;  %v3279_v55 = vrot.slane %v367_v47, 5  ;;  %v373_v57 = vrot.slane %v371_v48, 4  ;;  %v757_v58 = vrot.slane %v755_v2, 4  ;;  %v758_v59 = vrot.slane %v656_v42, 5 }
  0x1a   :  { %v1291_v60 = vrot.slane %v1289_v53, 5  ;;  %v377_v61 = vshll.u32 %v119_v49, 16  ;;  %v1062_v63 = vsel %vm3237_vm13, %v1053_v43, %v3269_v46  ;;  %v1287_v0 = vrot.slane %v3244_v26, 4  ;;  %v654_v5 = vld [vmem:[%s4793_s0] sm:$0xe] }
  0x1b   :  { %525 = vrot.lane.b32.xlu0 %v154_v41, %s3092_s26  ;;  %v1294_v1 = vrot.slane %v1292_v56, 6  ;;  %v374_v3 = vor.u32 %v373_v57, %v3279_v55  ;;  %v1022_v6 = vld [vmem:[%s4793_s0 + $0x70] sm:$0xf]  ;;  %v1298_v7 = vshrl.u32 %v1021_v62, 16  ;;  %v1301_v8 = vshll.u32 %v1021_v62, 16 }
  0x1c   :  { %v1628_v9 = vld [vmem:[%s4793_s0 + $0x18] sm:$0xc]  ;;  %v364_v10 = vor.u32 %v363_v54, %v360_v52  ;;  %v379_v14 = vrot.slane %v377_v61, 5  ;;  %v1629_v15 = vld [vmem:[%s4793_s0 + $0x1c] sm:$0xf]  ;;  %v759_v17 = vsel %vm3147_vm4, %v757_v58, %v758_v59  ;;  %v818_v20 = vrot.slane %v3294_v4, 5 }
  0x1d   :  { %v1295_v11 = vor.u32 %v1294_v1, %v1291_v60  ;;  %v375_v12 = vrot.slane %v374_v3, 4  ;;  %v1630_v16 = vld [vmem:[%s4793_s0 + $0x20] sm:$0x3]  ;;  %v1300_v21 = vrot.slane %v1298_v7, 5  ;;  %v1303_v23 = vrot.slane %v1301_v8, 6 }
  0x1e   :  { %v2999_v19 = vld [vmem:[#allocation2 + $0x14] sm:$0xf]  ;;  %v1307_v25 = vshrl.u32 %v1022_v6, 16  ;;  %v1310_v26 = vshll.u32 %v1022_v6, 16  ;;  %v2767_v27 = vrot.slane %v1628_v9, 10  ;;  %v1737_v30 = vrot.slane %v1629_v15, 6 }
  0x1f   :  { %v1296_v24 = vsel %vm3237_vm13, %v1287_v0, %v1295_v11  ;;  %v94_v28 = vld [vmem:[%s4793_s0 + $0x10] sm:$0xf]  ;;  %v1740_v31 = vrot.slane %v1630_v16, 6  ;;  %v93_v33 = vld [vmem:[%s4793_s0 + $0xc] sm:$0xf]  ;;  %v365_v34 = vrot.slane %v364_v10, 4  ;;  %v380_v35 = vsel %vm3165_vm5, %v375_v12, %v379_v14 }
  0x20   :  { %1493 = vrot.lane.b32.xlu1 %v1062_v63, %s3093_s29  ;;  %v2793_v29 = vld [vmem:[#allocation2 + $0x18] sm:$0xf0]  ;;  %1527 = vrot.lane.b32.xlu2 %v1296_v24, %s3093_s29  ;;  %v2749_v36 = vrot.slane %v654_v5, 9  ;;  %v1304_v37 = vor.u32 %v1303_v23, %v1300_v21  ;;  %v996_v38 = vld [vmem:[%s4793_s0 + $0x8] sm:$0x3]  ;;  %v1738_v41 = vsel %vm3181_vm9, %v2767_v27, %v1737_v30  ;;  %v1739_v42 = vrot.slane %v1737_v30, 4 }
  0x21   :  { %v2796_v39 = vor.u32 %v2999_v19, %v2793_v29  ;;  %v683_v40 = vld [vmem:[%s4793_s0 + $0x74] sm:$0x1]  ;;  %v175_v43 = vshll.u32 %v94_v28, 16  ;;  %v1309_v44 = vrot.slane %v1307_v25, 5  ;;  %v1312_v45 = vrot.slane %v1310_v26, 6 }
  0x22   :  { %1869 = vst.msk [vmem:[#allocation2 + $0x24] sm:$0xf] %vm57_vm6, %v1738_v41  ;;  %v166_v47 = vshrl.u32 %v93_v33, 16  ;;  %v179_v48 = vshrl.u32 %v94_v28, 16  ;;  %v1741_v49 = vsel %vm3181_vm9, %v1739_v42, %v1740_v31  ;;  %v169_v50 = vshll.u32 %v93_v33, 16 }
  0x23   :  { %867 = vrot.lane.b32.xlu0 %v759_v17, %s3091_s19  ;;  %v3338_v52 = vrot.slane %v175_v43, 5  ;;  %v1065_v53 = vshrl.u32 %v996_v38, 16  ;;  %v756_v54 = vsel %vm3147_vm4, %v2749_v36, %v755_v2  ;;  %1870 = vst.msk [vmem:[#allocation2 + $0x2c] sm:$0xf] %vm57_vm6, %v1741_v49  ;;  %v1068_v56 = vshll.u32 %v996_v38, 16 }
  0x24   :  { %v95_v57 = vld [vmem:[%s4793_s0 + $0x14] sm:$0x1]  ;;  %v181_v58 = vrot.slane %v179_v48, 4  ;;  %v370_v59 = vsel %vm3165_vm5, %v365_v34, %v3279_v55  ;;  %v820_v51 = vrot.slane %v818_v20, 4  ;;  %v821_v2 = vrot.slane %v683_v40, 5 }
  0x25   :  { %v1067_v60 = vrot.slane %v1065_v53, 5  ;;  %v1305_v61 = vrot.slane %v1304_v37, 4  ;;  %v3355_v62 = vor.u32 %v1312_v45, %v1309_v44  ;;  %v168_v63 = vrot.slane %v166_v47, 4  ;;  %v997_v1 = vld [vmem:[%s4793_s0 + $0xc] sm:$0xe] }
  0x26   :  { %v1070_v0 = vrot.slane %v1068_v56, 6  ;;  %v171_v3 = vrot.slane %v169_v50, 5  ;;  %v1063_v55 = vrot.slane %v3269_v46, 4  ;;  %v182_v5 = vor.u32 %v181_v58, %v3338_v52  ;;  %v1631_v10 = vld [vmem:[%s4793_s0 + $0x24] sm:$0xc] }
  0x27   :  { %2950 = vmatmul.msk.bf16.gmra.mxu1 %vm2153_vm10, %v2796_v39  ;;  %v185_v6 = vshll.u32 %v95_v57, 16  ;;  %v1074_v8 = vshrl.u32 %v997_v1, 16  ;;  %v1077_v9 = vshll.u32 %v997_v1, 16  ;;  %v1632_v11 = vld [vmem:[%s4793_s0 + $0x28] sm:$0xf]  ;;  %v822_v12 = vsel %vm3147_vm4, %v820_v51, %v821_v2 }
  0x28   :  { %563 = vrot.lane.b32.xlu1 %v380_v35, %s3092_s26  ;;  %865 = vrot.lane.b32.xlu2 %v756_v54, %s3091_s19  ;;  %v1071_v7 = vor.u32 %v1070_v0, %v1067_v60  ;;  %v1314_v46 = vsel %vm3237_vm13, %v1305_v61, %v3355_v62  ;;  %v998_v14 = vld [vmem:[%s4793_s0 + $0x10] sm:$0xf]  ;;  %v1633_v15 = vld [vmem:[%s4793_s0 + $0x2c] sm:$0x3]  ;;  %v2768_v16 = vrot.slane %v1631_v10, 10  ;;  %v183_v17 = vrot.slane %v182_v5, 4 }
  0x29   :  { %v187_v19 = vrot.slane %v185_v6, 5  ;;  %v681_v21 = vld [vmem:[%s4793_s0 + $0x6c] sm:$0xe]  ;;  %v1744_v23 = vrot.slane %v1632_v11, 6  ;;  %v1747_v24 = vrot.slane %v1633_v15, 6  ;;  %v172_v26 = vor.u32 %v171_v3, %v168_v63 }
  0x2a   :  { %v3001_v25 = vld [vmem:[#allocation2 + $0x24] sm:$0xf]  ;;  %v1072_v27 = vsel %vm3237_vm13, %v1063_v55, %v1071_v7  ;;  %v1076_v28 = vrot.slane %v1074_v8, 5  ;;  %v1079_v29 = vrot.slane %v1077_v9, 6  ;;  %v120_v30 = vld [vmem:[%s4793_s0 + $0x78] sm:$0xf] }
  0x2b   :  { %561 = vrot.lane.b32.xlu0 %v370_v59, %s3092_s26  ;;  %v1083_v31 = vshrl.u32 %v998_v14, 16  ;;  %v1086_v33 = vshll.u32 %v998_v14, 16  ;;  %v1745_v34 = vsel %vm3181_vm9, %v2768_v16, %v1744_v23  ;;  %v1746_v35 = vrot.slane %v1744_v23, 4  ;;  %v1023_v36 = vld [vmem:[%s4793_s0 + $0x74] sm:$0x3] }
  0x2c   :  { %v2801_v37 = vld [vmem:[#allocation2 + $0x28] sm:$0xf0]  ;;  %1871 = vst.msk [vmem:[#allocation2 + $0x34] sm:$0xf] %vm57_vm6, %v1745_v34  ;;  %v121_v38 = vld [vmem:[%s4793_s0 + $0x7c] sm:$0xf]  ;;  %v188_v53 = vsel %vm3165_vm5, %v183_v17, %v187_v19  ;;  %v1080_v54 = vor.u32 %v1079_v29, %v1076_v28 }
  0x2d   :  { %v1748_v39 = vsel %vm3181_vm9, %v1746_v35, %v1747_v24  ;;  %v382_v40 = vshrl.u32 %v120_v30, 16  ;;  %v385_v41 = vshll.u32 %v120_v30, 16  ;;  %v2758_v42 = vrot.slane %v681_v21, 9  ;;  %v3407_v48 = vld [vmem:[%s4793_s0 + $0x10] sm:$0xf] }
  0x2e   :  { %1872 = vst.msk [vmem:[#allocation2 + $0x3c] sm:$0xf] %vm57_vm6, %v1748_v39  ;;  %v1317_v43 = vshrl.u32 %v1023_v36, 16  ;;  %v1320_v44 = vshll.u32 %v1023_v36, 16  ;;  %v2804_v45 = vor.u32 %v3001_v25, %v2801_v37  ;;  %v173_v47 = vrot.slane %v172_v26, 4 }
  0x2f   :  { %v391_v49 = vshll.u32 %v121_v38, 16  ;;  %v395_v50 = vshrl.u32 %v121_v38, 16  ;;  %v1085_v56 = vrot.slane %v1083_v31, 5  ;;  %v1088_v57 = vrot.slane %v1086_v33, 6  ;;  %v659_v58 = vld [vmem:[%s4793_s0 + $0x14] sm:$0x1] }
  0x30   :  { %1529 = vrot.lane.b32.xlu1 %v1314_v46, %s3093_s29  ;;  %1495 = vrot.lane.b32.xlu2 %v1072_v27, %s3093_s29  ;;  %v384_v59 = vrot.slane %v382_v40, 4  ;;  %v387_v51 = vrot.slane %v385_v41, 5  ;;  %v762_v2 = vrot.slane %v3407_v48, 5  ;;  %v819_v60 = vsel %vm3147_vm4, %v2758_v42, %v818_v20  ;;  %v1634_v0 = vld [vmem:[%s4793_s0 + $0x30] sm:$0xc] }
  0x31   :  { %v1319_v61 = vrot.slane %v1317_v43, 5  ;;  %v1322_v63 = vrot.slane %v1320_v44, 6  ;;  %v178_v1 = vsel %vm3165_vm5, %v173_v47, %v3338_v52  ;;  %v3427_v3 = vrot.slane %v391_v49, 5  ;;  %v1635_v20 = vld [vmem:[%s4793_s0 + $0x34] sm:$0xf] }
  0x32   :  { %v397_v4 = vrot.slane %v395_v50, 4  ;;  %v1081_v55 = vrot.slane %v1080_v54, 4  ;;  %v3432_v5 = vor.u32 %v1088_v57, %v1085_v56  ;;  %v122_v6 = vld [vmem:[%s4793_s0 + $0x80] sm:$0x1]  ;;  %v1636_v52 = vld [vmem:[%s4793_s0 + $0x38] sm:$0x3]  ;;  %v388_v8 = vor.u32 %v387_v51, %v384_v59 }
  0x33   :  { %903 = vrot.lane.b32.xlu0 %v822_v12, %s3091_s19  ;;  %v765_v7 = vrot.slane %v659_v58, 5  ;;  %v1024_v9 = vld [vmem:[%s4793_s0 + $0x78] sm:$0xe]  ;;  %v2769_v10 = vrot.slane %v1634_v0, 10  ;;  %v1751_v11 = vrot.slane %v1635_v20, 6  ;;  %v764_v12 = vrot.slane %v762_v2, 4 }
  0x34   :  { %v1315_v46 = vrot.slane %v3355_v62, 4  ;;  %v1323_v14 = vor.u32 %v1322_v63, %v1319_v61  ;;  %v1754_v15 = vrot.slane %v1636_v52, 6  ;;  %v398_v16 = vor.u32 %v397_v4, %v3427_v3  ;;  %v1025_v62 = vld [vmem:[%s4793_s0 + $0x7c] sm:$0xf]  ;;  %v657_v30 = vld [vmem:[%s4793_s0 + $0xc] sm:$0xe] }
  0x35   :  { %v401_v17 = vshll.u32 %v122_v6, 16  ;;  %v1752_v19 = vsel %vm3181_vm9, %v2769_v10, %v1751_v11  ;;  %v1753_v21 = vrot.slane %v1751_v11, 4  ;;  %v1090_v23 = vsel %vm3237_vm13, %v1081_v55, %v3432_v5  ;;  %v3465_v29 = vld [vmem:[%s4793_s0 + $0x7c] sm:$0xf]  ;;  %v3003_v34 = vld [vmem:[#allocation2 + $0x34] sm:$0xf] }
  0x36   :  { %v1326_v24 = vshrl.u32 %v1024_v9, 16  ;;  %v1329_v25 = vshll.u32 %v1024_v9, 16  ;;  %1873 = vst.msk [vmem:[#allocation2 + $0x44] sm:$0xf] %vm57_vm6, %v1752_v19  ;;  %v389_v26 = vrot.slane %v388_v8, 4  ;;  %v1324_v28 = vsel %vm3237_vm13, %v1315_v46, %v1323_v14 }
  0x37   :  { %2951 = vmatmul.msk.bf16.gmra.mxu1 %vm2153_vm10, %v2804_v45  ;;  %v1755_v27 = vsel %vm3181_vm9, %v1753_v21, %v1754_v15  ;;  %v97_v31 = vld [vmem:[%s4793_s0 + $0x1c] sm:$0xf]  ;;  %v766_v33 = vsel %vm3147_vm4, %v764_v12, %v765_v7  ;;  %v399_v35 = vrot.slane %v398_v16, 4  ;;  %v403_v36 = vrot.slane %v401_v17, 5  ;;  %v999_v37 = vld [vmem:[%s4793_s0 + $0x14] sm:$0x3] }
  0x38   :  { %531 = vrot.lane.b32.xlu1 %v188_v53, %s3092_s26  ;;  %901 = vrot.lane.b32.xlu2 %v819_v60, %s3091_s19  ;;  %1874 = vst.msk [vmem:[#allocation2 + $0x4c] sm:$0xf] %vm57_vm6, %v1755_v27  ;;  %v2809_v38 = vld [vmem:[#allocation2 + $0x38] sm:$0xf0]  ;;  %v1328_v39 = vrot.slane %v1326_v24, 5  ;;  %v1331_v40 = vrot.slane %v1329_v25, 6  ;;  %v394_v54 = vsel %vm3165_vm5, %v389_v26, %v3427_v3 }
  0x39   :  { %v1335_v41 = vshrl.u32 %v1025_v62, 16  ;;  %v1338_v42 = vshll.u32 %v1025_v62, 16  ;;  %v199_v43 = vshll.u32 %v97_v31, 16  ;;  %v203_v44 = vshrl.u32 %v97_v31, 16  ;;  %v1637_v50 = vld [vmem:[%s4793_s0 + $0x3c] sm:$0xc] }
  0x3a   :  { %v2750_v45 = vrot.slane %v657_v30, 9  ;;  %v1093_v47 = vshrl.u32 %v999_v37, 16  ;;  %v1096_v49 = vshll.u32 %v999_v37, 16  ;;  %v2812_v53 = vor.u32 %v3003_v34, %v2809_v38  ;;  %v1638_v57 = vld [vmem:[%s4793_s0 + $0x40] sm:$0xf]  ;;  %v3036_v27 = vld [vmem:[%s4794_s1 + $0x38] sm:$0xff] }
  0x3b   :  { %529 = vrot.lane.b32.xlu0 %v178_v1, %s3092_s26  ;;  %v825_v56 = vrot.slane %v3465_v29, 5  ;;  %v404_v58 = vsel %vm3165_vm5, %v399_v35, %v403_v36  ;;  %v1332_v59 = vor.u32 %v1331_v40, %v1328_v39  ;;  %v1337_v51 = vrot.slane %v1335_v41, 5  ;;  %v96_v61 = vld [vmem:[%s4793_s0 + $0x18] sm:$0xf]  ;;  %v1639_v63 = vld [vmem:[%s4793_s0 + $0x44] sm:$0x3]  ;;  %3047 = vmatpush.bf16.msra.mxu3 %v3036_v27 }
  0x3c   :  { %v1340_v60 = vrot.slane %v1338_v42, 6  ;;  %v686_v0 = vld [vmem:[%s4793_s0 + $0x80] sm:$0x1]  ;;  %v3503_v1 = vrot.slane %v199_v43, 5  ;;  %v205_v3 = vrot.slane %v203_v44, 4  ;;  %v2770_v4 = vrot.slane %v1637_v50, 10  ;;  %2202 = vmatpush.bf16.msra.mxu0 %v3036_v27 }
  0x3d   :  { %v1758_v20 = vrot.slane %v1638_v57, 6  ;;  %v763_v55 = vsel %vm3147_vm4, %v2750_v45, %v762_v2  ;;  %v1095_v6 = vrot.slane %v1093_v47, 5  ;;  %v1098_v52 = vrot.slane %v1096_v49, 6  ;;  %v98_v7 = vld [vmem:[%s4793_s0 + $0x20] sm:$0x1] }
  0x3e   :  { %v1761_v8 = vrot.slane %v1639_v63, 6  ;;  %v190_v9 = vshrl.u32 %v96_v61, 16  ;;  %v193_v10 = vshll.u32 %v96_v61, 16  ;;  %v1000_v48 = vld [vmem:[%s4793_s0 + $0x18] sm:$0xe]  ;;  %v1333_v12 = vrot.slane %v1332_v59, 4 }
  0x3f   :  { %v1759_v2 = vsel %vm3181_vm9, %v2770_v4, %v1758_v20  ;;  %v1760_v11 = vrot.slane %v1758_v20, 4  ;;  %v3519_v46 = vor.u32 %v1340_v60, %v1337_v51  ;;  %v206_v14 = vor.u32 %v205_v3, %v3503_v1  ;;  %v1001_v62 = vld [vmem:[%s4793_s0 + $0x1c] sm:$0xf]  ;;  %v3005_v34 = vld [vmem:[#allocation2 + $0x44] sm:$0xf]  ;;  %v3035_v61 = vld [vmem:[%s4794_s1 + $0x30] sm:$0xff] }
  0x40   :  { %1497 = vrot.lane.b32.xlu1 %v1090_v23, %s3093_s29  ;;  %1531 = vrot.lane.b32.xlu2 %v1324_v28, %s3093_s29  ;;  %1875 = vst.msk [vmem:[#allocation2 + $0x54] sm:$0xf] %vm57_vm6, %v1759_v2  ;;  %v209_v15 = vshll.u32 %v98_v7, 16  ;;  %v828_v17 = vrot.slane %v686_v0, 5  ;;  %v1091_v19 = vrot.slane %v3432_v5, 4  ;;  %v1099_v21 = vor.u32 %v1098_v52, %v1095_v6 }
  0x41   :  { %v1762_v16 = vsel %vm3181_vm9, %v1760_v11, %v1761_v8  ;;  %v1102_v23 = vshrl.u32 %v1000_v48, 16  ;;  %v827_v24 = vrot.slane %v825_v56, 4  ;;  %v192_v25 = vrot.slane %v190_v9, 4  ;;  %v124_v38 = vld [vmem:[%s4793_s0 + $0x88] sm:$0xf]  ;;  %3048 = vmatpush.bf16.msra.mxu3 %v3035_v61  ;;  %2203 = vmatpush.bf16.msra.mxu0 %v3035_v61 }
  0x42   :  { %1876 = vst.msk [vmem:[#allocation2 + $0x5c] sm:$0xf] %vm57_vm6, %v1762_v16  ;;  %v195_v26 = vrot.slane %v193_v10, 5  ;;  %v1342_v5 = vsel %vm3237_vm13, %v1333_v12, %v3519_v46  ;;  %v1105_v28 = vshll.u32 %v1000_v48, 16  ;;  %v207_v30 = vrot.slane %v206_v14, 4 }
  0x43   :  { %871 = vrot.lane.b32.xlu0 %v766_v33, %s3091_s19  ;;  %v211_v31 = vrot.slane %v209_v15, 5  ;;  %v684_v33 = vld [vmem:[%s4793_s0 + $0x78] sm:$0xe]  ;;  %v1100_v35 = vsel %vm3237_vm13, %v1091_v19, %v1099_v21  ;;  %v1104_v36 = vrot.slane %v1102_v23, 5  ;;  %v1111_v37 = vshrl.u32 %v1001_v62, 16  ;;  %v3034_v19 = vld [vmem:[%s4794_s1 + $0x28] sm:$0xff] }
  0x44   :  { %v1640_v39 = vld [vmem:[%s4793_s0 + $0x48] sm:$0xc]  ;;  %v829_v40 = vsel %vm3147_vm4, %v827_v24, %v828_v17  ;;  %v196_v41 = vor.u32 %v195_v26, %v192_v25  ;;  %v1026_v42 = vld [vmem:[%s4793_s0 + $0x80] sm:$0x3]  ;;  %v1641_v43 = vld [vmem:[%s4793_s0 + $0x4c] sm:$0xf] }
  0x45   :  { %v1642_v44 = vld [vmem:[%s4793_s0 + $0x50] sm:$0x3]  ;;  %v2817_v45 = vld [vmem:[#allocation2 + $0x48] sm:$0xf0]  ;;  %v3566_v47 = vld [vmem:[%s4793_s0 + $0x1c] sm:$0xf]  ;;  %v212_v20 = vsel %vm3165_vm5, %v207_v30, %v211_v31  ;;  %3049 = vmatpush.bf16.msra.mxu3 %v3034_v19  ;;  %2204 = vmatpush.bf16.msra.mxu0 %v3034_v19 }
  0x46   :  { %v1107_v49 = vrot.slane %v1105_v28, 6  ;;  %v1114_v50 = vshll.u32 %v1001_v62, 16  ;;  %v415_v57 = vshll.u32 %v124_v38, 16  ;;  %v2771_v59 = vrot.slane %v1640_v39, 10  ;;  %v662_v6 = vld [vmem:[%s4793_s0 + $0x20] sm:$0x1] }
  0x47   :  { %2952 = vmatmul.msk.bf16.gmra.mxu1 %vm2153_vm10, %v2812_v53  ;;  %v2759_v53 = vrot.slane %v684_v33, 9  ;;  %v1345_v51 = vshrl.u32 %v1026_v42, 16  ;;  %v1348_v60 = vshll.u32 %v1026_v42, 16  ;;  %v1765_v63 = vrot.slane %v1641_v43, 6  ;;  %v125_v15 = vld [vmem:[%s4793_s0 + $0x8c] sm:$0x1] }
  0x48   :  { %567 = vrot.lane.b32.xlu1 %v404_v58, %s3092_s26  ;;  %869 = vrot.lane.b32.xlu2 %v763_v55, %s3091_s19  ;;  %v419_v58 = vshrl.u32 %v124_v38, 16  ;;  %v1768_v0 = vrot.slane %v1642_v44, 6  ;;  %v2820_v3 = vor.u32 %v3005_v34, %v2817_v45  ;;  %v197_v4 = vrot.slane %v196_v41, 4  ;;  %v1027_v24 = vld [vmem:[%s4793_s0 + $0x84] sm:$0xe] }
  0x49   :  { %v1113_v55 = vrot.slane %v1111_v37, 5  ;;  %v1108_v52 = vor.u32 %v1107_v49, %v1104_v36  ;;  %v1116_v7 = vrot.slane %v1114_v50, 6  ;;  %v1766_v8 = vsel %vm3181_vm9, %v2771_v59, %v1765_v63  ;;  %v41_v33 = vld [vmem:[%s4793_s0 + $0x60] sm:$0xf]  ;;  %v1643_v34 = vld [vmem:[%s4793_s0 + $0x54] sm:$0xc] }
  0x4a   :  { %v1767_v9 = vrot.slane %v1765_v63, 4  ;;  %v769_v10 = vrot.slane %v3566_v47, 5  ;;  %v826_v48 = vsel %vm3147_vm4, %v2759_v53, %v825_v56  ;;  %v3588_v11 = vrot.slane %v415_v57, 5  ;;  %1877 = vst.msk [vmem:[#allocation2 + $0x64] sm:$0xf] %vm57_vm6, %v1766_v8  ;;  %v3033_v37 = vld [vmem:[%s4794_s1 + $0x20] sm:$0xff] }
  0x4b   :  { %565 = vrot.lane.b32.xlu0 %v394_v54, %s3092_s26  ;;  %v123_v54 = vld [vmem:[%s4793_s0 + $0x84] sm:$0xf]  ;;  %v1347_v12 = vrot.slane %v1345_v51, 5  ;;  %v1350_v14 = vrot.slane %v1348_v60, 6  ;;  %v421_v16 = vrot.slane %v419_v58, 4  ;;  %v202_v29 = vsel %vm3165_vm5, %v197_v4, %v3503_v1  ;;  %3050 = vmatpush.bf16.msra.mxu3 %v3033_v37  ;;  %v3032_v59 = vld [vmem:[%s4794_s1 + $0x18] sm:$0xff] }
  0x4c   :  { %v406_v2 = vshrl.u32 %v123_v54, 16  ;;  %v1769_v17 = vsel %vm3181_vm9, %v1767_v9, %v1768_v0  ;;  %v409_v56 = vshll.u32 %v123_v54, 16  ;;  %v1109_v21 = vrot.slane %v1108_v52, 4  ;;  %74 = vst.msk [vmem:[#allocation2 + $0x80] sm:$0xf] %vm57_vm6, %v41_v33  ;;  %2205 = vmatpush.bf16.msra.mxu0 %v3033_v37 }
  0x4d   :  { %1878 = vst.msk [vmem:[#allocation2 + $0x6c] sm:$0xf] %vm57_vm6, %v1769_v17  ;;  %v3605_v23 = vor.u32 %v1116_v7, %v1113_v55  ;;  %v771_v25 = vrot.slane %v769_v10, 4  ;;  %v772_v1 = vrot.slane %v662_v6, 5  ;;  %v425_v26 = vshll.u32 %v125_v15, 16 }
  0x4e   :  { %v408_v62 = vrot.slane %v406_v2, 4  ;;  %v1343_v27 = vrot.slane %v3519_v46, 4  ;;  %v422_v28 = vor.u32 %v421_v16, %v3588_v11  ;;  %v411_v30 = vrot.slane %v409_v56, 5  ;;  %v1028_v46 = vld [vmem:[%s4793_s0 + $0x88] sm:$0xf] }
  0x4f   :  { %v1354_v31 = vshrl.u32 %v1027_v24, 16  ;;  %v1357_v36 = vshll.u32 %v1027_v24, 16  ;;  %v3632_v38 = vrot.slane %v425_v26, 5  ;;  %v660_v39 = vld [vmem:[%s4793_s0 + $0x18] sm:$0xe]  ;;  %v2772_v49 = vrot.slane %v1643_v34, 10  ;;  %3051 = vmatpush.bf16.msra.mxu3 %v3032_v59 }
  0x50   :  { %1533 = vrot.lane.b32.xlu1 %v1342_v5, %s3093_s29  ;;  %1499 = vrot.lane.b32.xlu2 %v1100_v35, %s3093_s29  ;;  %v1351_v5 = vor.u32 %v1350_v14, %v1347_v12  ;;  %v1118_v35 = vsel %vm3237_vm13, %v1109_v21, %v3605_v23  ;;  %v423_v42 = vrot.slane %v422_v28, 4  ;;  %v3645_v43 = vld [vmem:[%s4793_s0 + $0x88] sm:$0xf]  ;;  %v1645_v45 = vld [vmem:[%s4793_s0 + $0x5c] sm:$0x3]  ;;  %v773_v50 = vsel %vm3147_vm4, %v771_v25, %v772_v1 }
  0x51   :  { %v100_v44 = vld [vmem:[%s4793_s0 + $0x28] sm:$0xf]  ;;  %v3007_v53 = vld [vmem:[#allocation2 + $0x54] sm:$0xf]  ;;  %v412_v54 = vor.u32 %v411_v30, %v408_v62  ;;  %v1356_v57 = vrot.slane %v1354_v31, 5  ;;  %v1359_v60 = vrot.slane %v1357_v36, 6 }
  0x52   :  { %v1352_v41 = vsel %vm3237_vm13, %v1343_v27, %v1351_v5  ;;  %v1002_v58 = vld [vmem:[%s4793_s0 + $0x20] sm:$0x3]  ;;  %v2825_v51 = vld [vmem:[#allocation2 + $0x58] sm:$0xf0]  ;;  %v1363_v61 = vshrl.u32 %v1028_v46, 16  ;;  %v1366_v63 = vshll.u32 %v1028_v46, 16 }
  0x53   :  { %907 = vrot.lane.b32.xlu0 %v829_v40, %s3091_s19  ;;  %v1644_v40 = vld [vmem:[%s4793_s0 + $0x58] sm:$0xf]  ;;  %v99_v4 = vld [vmem:[%s4793_s0 + $0x24] sm:$0xf]  ;;  %v227_v55 = vshrl.u32 %v100_v44, 16  ;;  %v1775_v6 = vrot.slane %v1645_v45, 6 }
  0x54   :  { %v1772_v0 = vrot.slane %v1644_v40, 6  ;;  %v1121_v52 = vshrl.u32 %v1002_v58, 16  ;;  %v1124_v7 = vshll.u32 %v1002_v58, 16 }
  0x56   :  { %v1773_v8 = vsel %vm3181_vm9, %v2772_v49, %v1772_v0  ;;  %v1774_v9 = vrot.slane %v1772_v0, 4 }
  0x57   :  { %2953 = vmatmul.msk.bf16.gmra.mxu1 %vm2153_vm10, %v2820_v3  ;;  %v2751_v3 = vrot.slane %v660_v39, 9 }
  0x58   :  { %535 = vrot.lane.b32.xlu1 %v212_v20, %s3092_s26  ;;  %905 = vrot.lane.b32.xlu2 %v826_v48, %s3091_s19  ;;  %v223_v20 = vshll.u32 %v100_v44, 16 }
  0x5b   :  { %533 = vrot.lane.b32.xlu0 %v202_v29, %s3092_s26 }
  0x60   :  { %1501 = vrot.lane.b32.xlu1 %v1118_v35, %s3093_s29  ;;  %1535 = vrot.lane.b32.xlu2 %v1352_v41, %s3093_s29 }
  0x63   :  { %875 = vrot.lane.b32.xlu0 %v773_v50, %s3091_s19 }
  0x64   :  { %11 = vsyncpa [#allocation4], 0  ;;  %v2828_v48 = vor.u32 %v3007_v53, %v2825_v51  ;;  %v413_v2 = vrot.slane %v412_v54, 4  ;;  %v428_v12 = vsel %vm3165_vm5, %v423_v42, %v3632_v38  ;;  %v832_v14 = vrot.slane %v3645_v43, 5  ;;  %v42_v15 = vld [vmem:[%s4793_s0 + $0x64] sm:$0xf]  ;;  %2206 = vmatpush.bf16.msra.mxu0 %v3032_v59 }
  0x65   :  { %1879 = vst.msk [vmem:[#allocation2 + $0x74] sm:$0xf] %vm57_vm6, %v1773_v8  ;;  %v1360_v16 = vor.u32 %v1359_v60, %v1356_v57  ;;  %v1365_v17 = vrot.slane %v1363_v61, 5  ;;  %v1368_v29 = vrot.slane %v1366_v63, 6  ;;  %v3031_v56 = vld [vmem:[%s4794_s1 + $0x10] sm:$0xff]  ;;  %v1776_v19 = vsel %vm3181_vm9, %v1774_v9, %v1775_v6  ;;  %v3030_v30 = vld [vmem:[%s4794_s1 + $0x8] sm:$0xff] }
  0x66   :  { %75 = vst.msk [vmem:[#allocation2 + $0x88] sm:$0xf] %vm57_vm6, %v42_v15  ;;  %v689_v21 = vld [vmem:[%s4793_s0 + $0x8c] sm:$0x1]  ;;  %v770_v24 = vsel %vm3147_vm4, %v2751_v3, %v769_v10  ;;  %v214_v25 = vshrl.u32 %v99_v4, 16  ;;  %v217_v1 = vshll.u32 %v99_v4, 16  ;;  %3052 = vmatpush.bf16.msra.mxu3 %v3031_v56  ;;  %v418_v47 = vsel %vm3165_vm5, %v413_v2, %v3588_v11 }
  0x67   :  { %1880 = vst.msk [vmem:[#allocation2 + $0x7c] sm:$0xf] %vm57_vm6, %v1776_v19  ;;  %v3691_v26 = vrot.slane %v223_v20, 5  ;;  %v1123_v62 = vrot.slane %v1121_v52, 5  ;;  %v1126_v27 = vrot.slane %v1124_v7, 6  ;;  %v229_v28 = vrot.slane %v227_v55, 4  ;;  %2954 = vmatmul.msk.bf16.gmra.mxu1 %vm2153_vm10, %v2828_v48 }
  0x68   :  { %v101_v5 = vld [vmem:[%s4793_s0 + $0x2c] sm:$0x1]  ;;  %571 = vrot.lane.b32.xlu1 %v428_v12, %s3092_s26  ;;  %v1003_v10 = vld [vmem:[%s4793_s0 + $0x24] sm:$0xe]  ;;  %v834_v31 = vrot.slane %v832_v14, 4  ;;  %v835_v33 = vrot.slane %v689_v21, 5  ;;  %v3709_v35 = vor.u32 %v1368_v29, %v1365_v17  ;;  %2207 = vmatpush.bf16.msra.mxu0 %v3031_v56 }
  0x69   :  { %v1361_v34 = vrot.slane %v1360_v16, 4  ;;  %873 = vrot.lane.b32.xlu2 %v770_v24, %s3091_s19  ;;  %v216_v11 = vrot.slane %v214_v25, 4  ;;  %v219_v46 = vrot.slane %v217_v1, 5  ;;  %v1119_v36 = vrot.slane %v3605_v23, 4  ;;  %v1004_v42 = vld [vmem:[%s4793_s0 + $0x28] sm:$0xf] }
  0x6a   :  { %v233_v37 = vshll.u32 %v101_v5, 16  ;;  %v1127_v38 = vor.u32 %v1126_v27, %v1123_v62  ;;  %v230_v39 = vor.u32 %v229_v28, %v3691_v26  ;;  %v1130_v40 = vshrl.u32 %v1003_v10, 16  ;;  %3053 = vmatpush.bf16.msra.mxu3 %v3030_v30  ;;  %v25_v44 = vld [vmem:[%s4793_s0] sm:$0xf]  ;;  %v1647_v45 = vld [vmem:[%s4793_s0 + $0x64] sm:$0xf] }
  0x6b   :  { %569 = vrot.lane.b32.xlu0 %v418_v47, %s3092_s26  ;;  %v1133_v41 = vshll.u32 %v1003_v10, 16  ;;  %v1646_v23 = vld [vmem:[%s4793_s0 + $0x60] sm:$0xc]  ;;  %v1370_v49 = vsel %vm3237_vm13, %v1361_v34, %v3709_v35  ;;  %58 = vst.msk [vmem:[#allocation2] sm:$0xf] %vm57_vm6, %v25_v44  ;;  %v220_v54 = vor.u32 %v219_v46, %v216_v11  ;;  %v836_v51 = vsel %vm3147_vm4, %v834_v31, %v835_v33  ;;  %s3094_s24 = smov [#allocation3]  }
  0x6c   :  { %v26_v50 = vld [vmem:[%s4793_s0 + $0x4] sm:$0xf]  ;;  %v1648_v53 = vld [vmem:[%s4793_s0 + $0x68] sm:$0x3]  ;;  %2208 = vmatpush.bf16.msra.mxu0 %v3030_v30  ;;  %v235_v57 = vrot.slane %v233_v37, 5  ;;  %v1128_v61 = vsel %vm3237_vm13, %v1119_v36, %v1127_v38  ;;  %v231_v63 = vrot.slane %v230_v39, 4 }
  0x6d   :  { %v127_v58 = vld [vmem:[%s4793_s0 + $0x94] sm:$0xf]  ;;  %59 = vst.msk [vmem:[#allocation2 + $0x8] sm:$0xf] %vm57_vm6, %v26_v50  ;;  %v3029_v59 = vld [vmem:[%s4794_s1] sm:$0xff]  ;;  %v1132_v3 = vrot.slane %v1130_v40, 5 }
  0x6e   :  { %v3009_v60 = vld [vmem:[#allocation2 + $0x64] sm:$0xf]  ;;  %v1135_v4 = vrot.slane %v1133_v41, 6  ;;  %v1029_v20 = vld [vmem:[%s4793_s0 + $0x8c] sm:$0x3]  ;;  %3054 = vmatpush.bf16.msra.mxu3 %v3029_v59  ;;  %v2773_v55 = vrot.slane %v1646_v23, 10  ;;  %v236_v25 = vsel %vm3165_vm5, %v231_v63, %v235_v57 }
  0x6f   :  { %v687_v0 = vld [vmem:[%s4793_s0 + $0x84] sm:$0xe]  ;;  %v1779_v6 = vrot.slane %v1647_v45, 6  ;;  %v1782_v52 = vrot.slane %v1648_v53, 6  ;;  %v2833_v7 = vld [vmem:[#allocation2 + $0x68] sm:$0xf0] }
  0x70   :  { %1537 = vrot.lane.b32.xlu1 %v1370_v49, %s3093_s29  ;;  %v1139_v8 = vshrl.u32 %v1004_v42, 16  ;;  %v1142_v9 = vshll.u32 %v1004_v42, 16  ;;  %v439_v48 = vshll.u32 %v127_v58, 16  ;;  %v443_v2 = vshrl.u32 %v127_v58, 16  ;;  %2209 = vmatpush.bf16.msra.mxu0 %v3029_v59  ;;  %v126_v56 = vld [vmem:[%s4793_s0 + $0x90] sm:$0xf] }
  0x71   :  { %v221_v12 = vrot.slane %v220_v54, 4  ;;  %1503 = vrot.lane.b32.xlu2 %v1128_v61, %s3093_s29  ;;  %v2760_v15 = vrot.slane %v687_v0, 9  ;;  %v1780_v16 = vsel %vm3181_vm9, %v2773_v55, %v1779_v6  ;;  %v1781_v17 = vrot.slane %v1779_v6, 4  ;;  %v3759_v29 = vpop.permute.xlu2 %1525  ;;  %v3770_v1 = vld [vmem:[%s4793_s0 + $0x28] sm:$0xf]  ;;  %s2735_s25 = sshll.u32 %s3094_s24, 4  ;;  %s2736_s25 = int_to_ptr.vmem [resolvable:$true] %s2735_s25 }
  0x72   :  { %v1373_v19 = vshrl.u32 %v1029_v20, 16  ;;  %v1376_v21 = vshll.u32 %v1029_v20, 16  ;;  %1881 = vst.msk [vmem:[#allocation2 + $0x84] sm:$0xf] %vm57_vm6, %v1780_v16  ;;  %v2836_v24 = vor.u32 %v3009_v60, %v2833_v7  ;;  %v1136_v62 = vor.u32 %v1135_v4, %v1132_v3  ;;  %v128_v33 = vld [vmem:[%s4793_s0 + $0x98] sm:$0x1] }
  0x73   :  { %911 = vrot.lane.b32.xlu0 %v836_v51, %s3091_s19  ;;  %v1783_v27 = vsel %vm3181_vm9, %v1781_v17, %v1782_v52  ;;  %v1141_v5 = vrot.slane %v1139_v8, 5  ;;  %v1144_v28 = vrot.slane %v1142_v9, 6  ;;  %v3774_v47 = vrot.slane %v439_v48, 5  ;;  %v1030_v38 = vld [vmem:[%s4793_s0 + $0x90] sm:$0xe]  ;;  %s3095_s28 = smov 128  }
  0x74   :  { %v445_v10 = vrot.slane %v443_v2, 4  ;;  %1882 = vst.msk [vmem:[#allocation2 + $0x8c] sm:$0xf] %vm57_vm6, %v1783_v27  ;;  %v430_v30 = vshrl.u32 %v126_v56, 16  ;;  %v433_v31 = vshll.u32 %v126_v56, 16  ;;  %v833_v34 = vsel %vm3147_vm4, %v2760_v15, %v832_v14  ;;  %s3096_s1 = smov 8  }
  0x75   :  { %v1375_v11 = vrot.slane %v1373_v19, 5  ;;  %v1378_v46 = vrot.slane %v1376_v21, 6  ;;  %v226_v36 = vsel %vm3165_vm5, %v221_v12, %v3691_v26  ;;  %v776_v37 = vrot.slane %v3770_v1, 5  ;;  %v665_v43 = vld [vmem:[%s4793_s0 + $0x2c] sm:$0x1] }
  0x76   :  { %v1137_v14 = vrot.slane %v1136_v62, 4  ;;  %v3796_v39 = vor.u32 %v1144_v28, %v1141_v5  ;;  %v446_v40 = vor.u32 %v445_v10, %v3774_v47  ;;  %v449_v41 = vshll.u32 %v128_v33, 16  ;;  %v1031_v58 = vld [vmem:[%s4793_s0 + $0x94] sm:$0xf]  ;;  %v43_v59 = vld [vmem:[%s4793_s0 + $0x6c] sm:$0xf] }
  0x77   :  { %2955 = vmatmul.msk.bf16.gmra.mxu1 %vm2153_vm10, %v2836_v24  ;;  %vm621_vm14 = vcmask 519424   ;;  %vm961_vm15 = vcmask 781824   ;;  %v432_v42 = vrot.slane %v430_v30, 4  ;;  %v435_v44 = vrot.slane %v433_v31, 5  ;;  %76 = vst.msk [vmem:[#allocation2 + $0x90] sm:$0xf] %vm57_vm6, %v43_v59 }
  0x78   :  { %539 = vrot.lane.b32.xlu1 %v236_v25, %s3092_s26  ;;  %v1371_v23 = vrot.slane %v3709_v35, 4  ;;  %v1379_v45 = vor.u32 %v1378_v46, %v1375_v11  ;;  %v1382_v49 = vshrl.u32 %v1030_v38, 16  ;;  %v1385_v50 = vshll.u32 %v1030_v38, 16  ;;  %v3011_v63 = vld [vmem:[#allocation2 + $0x74] sm:$0xf] }
  0x79   :  { %909 = vrot.lane.b32.xlu2 %v833_v34, %s3091_s19  ;;  %v778_v53 = vrot.slane %v776_v37, 4  ;;  %v779_v54 = vrot.slane %v665_v43, 5  ;;  %vm1589_vm0 = vcmask 1044224   ;;  %v1146_v35 = vsel %vm3237_vm13, %v1137_v14, %v3796_v39  ;;  %v2841_v0 = vld [vmem:[#allocation2 + $0x78] sm:$0xf0] }
  0x7a   :  { %v898_v26 = vpop.permute.xlu1 %897  ;;  %v1528_v57 = vpop.permute.xlu2 %1527  ;;  %v447_v60 = vrot.slane %v446_v40, 4  ;;  %v451_v61 = vrot.slane %v449_v41, 5  ;;  %v436_v3 = vor.u32 %v435_v44, %v432_v42  ;;  %v103_v4 = vld [vmem:[%s4793_s0 + $0x34] sm:$0xf]  ;;  %v44_v20 = vld [vmem:[%s4793_s0 + $0x70] sm:$0xf]  ;;  %v1380_v55 = vsel %vm3237_vm13, %v1371_v23, %v1379_v45 }
  0x7b   :  { %537 = vrot.lane.b32.xlu0 %v226_v36, %s3092_s26  ;;  %v3827_v6 = vld [vmem:[%s4793_s0 + $0x94] sm:$0xf]  ;;  %v1384_v52 = vrot.slane %v1382_v49, 5  ;;  %v1387_v7 = vrot.slane %v1385_v50, 6  ;;  %v1391_v8 = vshrl.u32 %v1031_v58, 16  ;;  %v780_v9 = vsel %vm3147_vm4, %v778_v53, %v779_v54 }
  0x7c   :  { %v663_v48 = vld [vmem:[%s4793_s0 + $0x24] sm:$0xe]  ;;  %v1005_v2 = vld [vmem:[%s4793_s0 + $0x2c] sm:$0x3]  ;;  %v3843_v12 = vld [vmem:[%s4793_s0 + $0x98] sm:$0x1]  ;;  %v452_v56 = vsel %vm3165_vm5, %v447_v60, %v451_v61  ;;  %v2844_v24 = vor.u32 %v3011_v63, %v2841_v0 }
  0x7d   :  { %v558_v51 = vpop.permute.xlu0 %557  ;;  %v1394_v15 = vshll.u32 %v1031_v58, 16  ;;  %v247_v16 = vshll.u32 %v103_v4, 16  ;;  %77 = vst.msk [vmem:[#allocation2 + $0x98] sm:$0xf] %vm57_vm6, %v44_v20  ;;  %v102_v19 = vld [vmem:[%s4793_s0 + $0x30] sm:$0xf]  ;;  %v1388_v31 = vor.u32 %v1387_v7, %v1384_v52 }
  0x7e   :  { %638 = vst.msk [vmem:[#allocation2 + $0x80] sm:$0xf] %vm621_vm14, %v558_v51  ;;  %v251_v21 = vshrl.u32 %v103_v4, 16  ;;  %v2752_v25 = vrot.slane %v663_v48, 9  ;;  %v1149_v62 = vshrl.u32 %v1005_v2, 16  ;;  %v1152_v27 = vshll.u32 %v1005_v2, 16 }
  0x7f   :  { %978 = vst.msk [vmem:[#allocation2 + $0x80] sm:$0xf] %vm961_vm15, %v898_v26  ;;  %v1649_v5 = vld [vmem:[%s4793_s0 + $0x6c] sm:$0xc]  ;;  %v839_v10 = vrot.slane %v3827_v6, 5  ;;  %v842_v30 = vrot.slane %v3843_v12, 5 }
  0x80   :  { %1606 = vst.msk [vmem:[#allocation2 + $0x80] sm:$0xf] %vm1589_vm0, %v3759_v29  ;;  %1505 = vrot.lane.b32.xlu1 %v1146_v35, %s3093_s29  ;;  %v437_v29 = vrot.slane %v436_v3, 4  ;;  %v1393_v33 = vrot.slane %v1391_v8, 5  ;;  %v1396_v11 = vrot.slane %v1394_v15, 6  ;;  %v238_v46 = vshrl.u32 %v102_v19, 16 }
  0x81   :  { %1539 = vrot.lane.b32.xlu2 %v1380_v55, %s3093_s29  ;;  %v241_v36 = vshll.u32 %v102_v19, 16  ;;  %v3858_v38 = vrot.slane %v247_v16, 5  ;;  %v1650_v43 = vld [vmem:[%s4793_s0 + $0x70] sm:$0xf]  ;;  %v104_v14 = vld [vmem:[%s4793_s0 + $0x38] sm:$0x1]  ;;  %v777_v26 = vsel %vm3147_vm4, %v2752_v25, %v776_v37 }
  0x82   :  { %v900_v17 = vpop.permute.xlu1 %899  ;;  %v866_v28 = vpop.permute.xlu2 %865  ;;  %v253_v40 = vrot.slane %v251_v21, 4  ;;  %v2774_v41 = vrot.slane %v1649_v5, 10  ;;  %v1151_v42 = vrot.slane %v1149_v62, 5  ;;  %v1154_v44 = vrot.slane %v1152_v27, 6  ;;  %v1651_v23 = vld [vmem:[%s4793_s0 + $0x74] sm:$0x3] }
  0x83   :  { %879 = vrot.lane.b32.xlu0 %v780_v9, %s3091_s19  ;;  %v442_v45 = vsel %vm3165_vm5, %v437_v29, %v3774_v47  ;;  %v841_v1 = vrot.slane %v839_v10, 4  ;;  %v1006_v37 = vld [vmem:[%s4793_s0 + $0x30] sm:$0xe]  ;;  %v1786_v49 = vrot.slane %v1650_v43, 6  ;;  %v1389_v50 = vrot.slane %v1388_v31, 4 }
  0x84   :  { %v3886_v53 = vor.u32 %v1396_v11, %v1393_v33  ;;  %v240_v54 = vrot.slane %v238_v46, 4  ;;  %v254_v47 = vor.u32 %v253_v40, %v3858_v38  ;;  %v257_v59 = vshll.u32 %v104_v14, 16  ;;  %v1007_v4 = vld [vmem:[%s4793_s0 + $0x34] sm:$0xf]  ;;  %v27_v20 = vld [vmem:[%s4793_s0 + $0xc] sm:$0xf] }
  0x85   :  { %v560_v34 = vpop.permute.xlu0 %559  ;;  %v1787_v51 = vsel %vm3181_vm9, %v2774_v41, %v1786_v49  ;;  %v1789_v35 = vrot.slane %v1651_v23, 6  ;;  %v1147_v60 = vrot.slane %v3796_v39, 4  ;;  %v1155_v61 = vor.u32 %v1154_v44, %v1151_v42  ;;  %60 = vst.msk [vmem:[#allocation2 + $0x10] sm:$0xf] %vm57_vm6, %v27_v20  ;;  %v28_v7 = vld [vmem:[%s4793_s0 + $0x10] sm:$0xf] }
  0x86   :  { %639 = vst.msk [vmem:[#allocation2 + $0x88] sm:$0xf] %vm621_vm14, %v560_v34  ;;  %v1158_v63 = vshrl.u32 %v1006_v37, 16  ;;  %v1788_v0 = vrot.slane %v1786_v49, 4  ;;  %v1398_v52 = vsel %vm3237_vm13, %v1389_v50, %v3886_v53  ;;  %v1161_v39 = vshll.u32 %v1006_v37, 16 }
  0x87   :  { %979 = vst.msk [vmem:[#allocation2 + $0x88] sm:$0xf] %vm961_vm15, %v900_v17  ;;  %2956 = vmatmul.msk.bf16.gmra.mxu1 %vm2153_vm10, %v2844_v24  ;;  %v255_v8 = vrot.slane %v254_v47, 4  ;;  %v259_v9 = vrot.slane %v257_v59, 5  ;;  %v690_v48 = vld [vmem:[%s4793_s0 + $0x90] sm:$0xe]  ;;  %v843_v16 = vsel %vm3147_vm4, %v841_v1, %v842_v30 }
  0x88   :  { %1607 = vst.msk [vmem:[#allocation2 + $0x88] sm:$0xf] %vm1589_vm0, %v1528_v57  ;;  %575 = vrot.lane.b32.xlu1 %v452_v56, %s3092_s26  ;;  %v243_v57 = vrot.slane %v241_v36, 5  ;;  %v1790_v2 = vsel %vm3181_vm9, %v1788_v0, %v1789_v35  ;;  %v2847_v12 = vld [vmem:[#allocation2 + $0x80] sm:$0xf]  ;;  %v1156_v56 = vsel %vm3237_vm13, %v1147_v60, %v1155_v61  ;;  %v1160_v24 = vrot.slane %v1158_v63, 5 }
  0x89   :  { %877 = vrot.lane.b32.xlu2 %v777_v26, %s3091_s19  ;;  %1883 = vst.msk [vmem:[#allocation2 + $0x94] sm:$0xf] %vm57_vm6, %v1787_v51  ;;  %v3013_v17 = vld [vmem:[#allocation2 + $0x84] sm:$0xf]  ;;  %v2849_v29 = vld [vmem:[#allocation2 + $0x88] sm:$0xf0]  ;;  %v260_v44 = vsel %vm3165_vm5, %v255_v8, %v259_v9 }
  0x8a   :  { %v528_v58 = vpop.permute.xlu1 %527  ;;  %v1496_v3 = vpop.permute.xlu2 %1495  ;;  %v244_v21 = vor.u32 %v243_v57, %v240_v54  ;;  %v1167_v25 = vshrl.u32 %v1007_v4, 16  ;;  %v1032_v62 = vld [vmem:[%s4793_s0 + $0x98] sm:$0x3]  ;;  %61 = vst.msk [vmem:[#allocation2 + $0x18] sm:$0xf] %vm57_vm6, %v28_v7  ;;  %v1163_v27 = vrot.slane %v1161_v39, 6  ;;  %v2852_v36 = vor.u32 %v3013_v17, %v2849_v29 }
  0x8b   :  { %573 = vrot.lane.b32.xlu0 %v442_v45, %s3092_s26  ;;  %623 = vst.msk [vmem:[#allocation2 + $0x8] sm:$0xf] %vm621_vm14, %v528_v58  ;;  %v1170_v5 = vshll.u32 %v1007_v4, 16  ;;  %v3933_v31 = vld [vmem:[%s4793_s0 + $0x34] sm:$0xf]  ;;  %v2761_v33 = vrot.slane %v690_v48, 9 }
  0x8c   :  { %1884 = vst.msk [vmem:[#allocation2 + $0x9c] sm:$0xf] %vm57_vm6, %v1790_v2  ;;  %v129_v34 = vld [vmem:[%s4793_s0 + $0x9c] sm:$0xf]  ;;  %v1401_v11 = vshrl.u32 %v1032_v62, 16  ;;  %v1404_v46 = vshll.u32 %v1032_v62, 16  ;;  %v1164_v45 = vor.u32 %v1163_v27, %v1160_v24 }
  0x8d   :  { %v526_v55 = vpop.permute.xlu0 %525  ;;  %v245_v43 = vrot.slane %v244_v21, 4  ;;  %v668_v23 = vld [vmem:[%s4793_s0 + $0x38] sm:$0x1]  ;;  %v1169_v1 = vrot.slane %v1167_v25, 5  ;;  %v1172_v37 = vrot.slane %v1170_v5, 6  ;;  %v783_v49 = vrot.slane %v3933_v31, 5 }
  0x8e   :  { %622 = vst.msk [vmem:[#allocation2] sm:$0xf] %vm621_vm14, %v526_v55  ;;  %v454_v50 = vshrl.u32 %v129_v34, 16  ;;  %v840_v57 = vsel %vm3147_vm4, %v2761_v33, %v839_v10  ;;  %v457_v58 = vshll.u32 %v129_v34, 16  ;;  %v1403_v47 = vrot.slane %v1401_v11, 5 }
  0x8f   :  { %962 = vst.msk [vmem:[#allocation2] sm:$0xf] %vm961_vm15, %v866_v28  ;;  %v3014_v15 = vld [vmem:[#allocation2 + $0x84] sm:$0xf0]  ;;  %v130_v28 = vld [vmem:[%s4793_s0 + $0xa0] sm:$0xf]  ;;  %v250_v51 = vsel %vm3165_vm5, %v245_v43, %v3858_v38  ;;  %v3964_v63 = vor.u32 %v1172_v37, %v1169_v1 }
  0x90   :  { %v2848_v19 = vor.u32 %v3014_v15, %v2847_v12  ;;  %1541 = vrot.lane.b32.xlu1 %v1398_v52, %s3093_s29  ;;  %v463_v40 = vshll.u32 %v130_v28, 16  ;;  %v467_v41 = vshrl.u32 %v130_v28, 16  ;;  %v3015_v54 = vld [vmem:[#allocation2 + $0x94] sm:$0xf]  ;;  %v1406_v59 = vrot.slane %v1404_v46, 6 }
  0x91   :  { %1507 = vrot.lane.b32.xlu2 %v1156_v56, %s3093_s29  ;;  %v131_v6 = vld [vmem:[%s4793_s0 + $0xa4] sm:$0x1]  ;;  %v1165_v10 = vrot.slane %v1164_v45, 4  ;;  %v785_v4 = vrot.slane %v783_v49, 4  ;;  %v786_v20 = vrot.slane %v668_v23, 5  ;;  %v456_v38 = vrot.slane %v454_v50, 4 }
  0x92   :  { %2250 = vmatmul.bf16.vlgmr.msra.gmra.mxu3 %v2848_v19  ;;  %v1494_v30 = vpop.permute.xlu1 %1493  ;;  %v902_v14 = vpop.permute.xlu2 %901  ;;  %v3959_v35 = vrot.slane %v463_v40, 5  ;;  %v469_v60 = vrot.slane %v467_v41, 4  ;;  %v1033_v55 = vld [vmem:[%s4793_s0 + $0x9c] sm:$0xe]  ;;  %v459_v52 = vrot.slane %v457_v58, 5  ;;  %v1399_v39 = vrot.slane %v3886_v53, 4 }
  0x93   :  { %915 = vrot.lane.b32.xlu0 %v843_v16, %s3091_s19  ;;  %1590 = vst.msk [vmem:[#allocation2] sm:$0xf] %vm1589_vm0, %v1494_v30  ;;  %v2857_v61 = vld [vmem:[#allocation2 + $0x98] sm:$0xf0]  ;;  %v1407_v7 = vor.u32 %v1406_v59, %v1403_v47  ;;  %v473_v8 = vshll.u32 %v131_v6, 16  ;;  %v1174_v53 = vsel %vm3237_vm13, %v1165_v10, %v3964_v63  ;;  %v1410_v29 = vshrl.u32 %v1033_v55, 16 }
  0x94   :  { %v3940_v42 = vpop.f32.mrf.mxu1  ;;  %v2860_v0 = vor.u32 %v3015_v54, %v2857_v61  ;;  %v470_v2 = vor.u32 %v469_v60, %v3959_v35  ;;  %v106_v12 = vld [vmem:[%s4793_s0 + $0x40] sm:$0xf]  ;;  %v45_v15 = vld [vmem:[%s4793_s0 + $0x78] sm:$0xf]  ;;  %v1413_v56 = vshll.u32 %v1033_v55, 16  ;;  %v787_v30 = vsel %vm3147_vm4, %v785_v4, %v786_v20 }
  0x95   :  { %v868_v26 = vpop.permute.xlu0 %867  ;;  %78 = vst.msk [vmem:[#allocation2 + $0xa0] sm:$0xf] %vm57_vm6, %v45_v15  ;;  %v46_v19 = vld [vmem:[%s4793_s0 + $0x7c] sm:$0xf]  ;;  %v1034_v24 = vld [vmem:[%s4793_s0 + $0xa0] sm:$0xf]  ;;  %v1408_v62 = vsel %vm3237_vm13, %v1399_v39, %v1407_v7  ;;  %v460_v33 = vor.u32 %v459_v52, %v456_v38 }
  0x96   :  { %963 = vst.msk [vmem:[#allocation2 + $0x8] sm:$0xf] %vm961_vm15, %v868_v26  ;;  %2958 = vmatmul.msk.bf16.vlgmr.msra.gmra.mxu2 %vm2153_vm10, %v2860_v0  ;;  %v666_v27 = vld [vmem:[%s4793_s0 + $0x30] sm:$0xe]  ;;  %v271_v5 = vshll.u32 %v106_v12, 16  ;;  %v275_v28 = vshrl.u32 %v106_v12, 16 }
  0x97   :  { %1591 = vst.msk [vmem:[#allocation2 + $0x8] sm:$0xf] %vm1589_vm0, %v1496_v3  ;;  %2957 = vmatmul.msk.bf16.gmra.mxu1 %vm2153_vm10, %v2852_v36  ;;  %v471_v34 = vrot.slane %v470_v2, 4  ;;  %v475_v11 = vrot.slane %v473_v8, 5  ;;  %v1008_v46 = vld [vmem:[%s4793_s0 + $0x38] sm:$0x3] }
  0x98   :  { %543 = vrot.lane.b32.xlu1 %v260_v44, %s3092_s26  ;;  %79 = vst.msk [vmem:[#allocation2 + $0xa8] sm:$0xf] %vm57_vm6, %v46_v19  ;;  %v4012_v36 = vld [vmem:[%s4793_s0 + $0xa0] sm:$0xf]  ;;  %v1412_v43 = vrot.slane %v1410_v29, 5  ;;  %v1419_v40 = vshrl.u32 %v1034_v24, 16 }
  0x99   :  { %913 = vrot.lane.b32.xlu2 %v840_v57, %s3091_s19  ;;  %v1422_v41 = vshll.u32 %v1034_v24, 16  ;;  %v2753_v44 = vrot.slane %v666_v27, 9  ;;  %v105_v23 = vld [vmem:[%s4793_s0 + $0x3c] sm:$0xf]  ;;  %v4023_v1 = vrot.slane %v271_v5, 5  ;;  %v1177_v37 = vshrl.u32 %v1008_v46, 16 }
  0x9a   :  { %v564_v3 = vpop.permute.xlu1 %563  ;;  %v2783_v9 = vld [vmem:[#allocation2] sm:$0xf]  ;;  %v1532_v48 = vpop.permute.xlu2 %1531  ;;  %v1653_v45 = vld [vmem:[%s4793_s0 + $0x7c] sm:$0xf]  ;;  %v1180_v50 = vshll.u32 %v1008_v46, 16  ;;  %v277_v54 = vrot.slane %v275_v28, 4  ;;  %v476_v61 = vsel %vm3165_vm5, %v471_v34, %v475_v11 }
  0x9b   :  { %541 = vrot.lane.b32.xlu0 %v250_v51, %s3092_s26  ;;  %641 = vst.msk [vmem:[#allocation2 + $0x98] sm:$0xf] %vm621_vm14, %v564_v3  ;;  %v461_v57 = vrot.slane %v460_v33, 4  ;;  %v846_v47 = vrot.slane %v4012_v36, 5  ;;  %v107_v59 = vld [vmem:[%s4793_s0 + $0x44] sm:$0x1]  ;;  %v784_v38 = vsel %vm3147_vm4, %v2753_v44, %v783_v49 }
  0x9c   :  { %v3983_v17 = vpop.f32.mrf.mxu1  ;;  %v1793_v51 = vrot.slane %v1653_v45, 6  ;;  %v695_v10 = vld [vmem:[%s4793_s0 + $0xa4] sm:$0x1]  ;;  %v1421_v3 = vrot.slane %v1419_v40, 5  ;;  %v1424_v4 = vrot.slane %v1422_v41, 6  ;;  %v262_v55 = vshrl.u32 %v105_v23, 16 }
  0x9d   :  { %v562_v16 = vpop.permute.xlu0 %561  ;;  %v1652_v20 = vld [vmem:[%s4793_s0 + $0x78] sm:$0xc]  ;;  %v265_v52 = vshll.u32 %v105_v23, 16  ;;  %v1179_v7 = vrot.slane %v1177_v37, 5  ;;  %v1182_v8 = vrot.slane %v1180_v50, 6  ;;  %v281_v2 = vshll.u32 %v107_v59, 16 }
  0x9e   :  { %640 = vst.msk [vmem:[#allocation2 + $0x90] sm:$0xf] %vm621_vm14, %v562_v16  ;;  %v2998_v21 = vld [vmem:[#allocation2 + $0x4] sm:$0xf0]  ;;  %v2775_v39 = vrot.slane %v1652_v20, 10  ;;  %v466_v12 = vsel %vm3165_vm5, %v461_v57, %v3959_v35  ;;  %v1795_v15 = vrot.slane %v1793_v51, 4 }
  0x9f   :  { %980 = vst.msk [vmem:[#allocation2 + $0x90] sm:$0xf] %vm961_vm15, %v902_v14  ;;  %v2784_v25 = vor.u32 %v2998_v21, %v2783_v9  ;;  %v1415_v14 = vrot.slane %v1413_v56, 6  ;;  %v278_v9 = vor.u32 %v277_v54, %v4023_v1  ;;  %v1654_v31 = vld [vmem:[%s4793_s0 + $0x80] sm:$0x3]  ;;  %v849_v56 = vrot.slane %v695_v10, 5 }
  0xa0   :  { %1509 = vrot.lane.b32.xlu1 %v1174_v53, %s3093_s29  ;;  %v1794_v49 = vsel %vm3181_vm9, %v2775_v39, %v1793_v51  ;;  %v4057_v53 = vor.u32 %v1424_v4, %v1421_v3  ;;  %v1796_v29 = vrot.slane %v1654_v31, 6  ;;  %v264_v19 = vrot.slane %v262_v55, 4  ;;  %v30_v40 = vld [vmem:[%s4793_s0 + $0x1c] sm:$0xf]  ;;  %v133_v37 = vld [vmem:[%s4793_s0 + $0xac] sm:$0xf] }
  0xa1   :  { %2210 = vmatmul.bf16.vlgmr.msra.gmra.mxu0 %v2784_v25  ;;  %1543 = vrot.lane.b32.xlu2 %v1408_v62, %s3093_s29  ;;  %v1416_v0 = vor.u32 %v1415_v14, %v1412_v43  ;;  %1885 = vst.msk [vmem:[#allocation2 + $0xa4] sm:$0xf] %vm57_vm6, %v1794_v49  ;;  %v267_v21 = vrot.slane %v265_v52, 5  ;;  %v1175_v24 = vrot.slane %v3964_v63, 4  ;;  %v1009_v25 = vld [vmem:[%s4793_s0 + $0x3c] sm:$0xe]  ;;  %v1183_v62 = vor.u32 %v1182_v8, %v1179_v7 }
  0xa2   :  { %v1530_v26 = vpop.permute.xlu1 %1529  ;;  %v870_v58 = vpop.permute.xlu2 %869  ;;  %v4067_v27 = vrot.slane %v278_v9, 4  ;;  %v4069_v5 = vrot.slane %v281_v2, 5  ;;  %v1797_v28 = vsel %vm3181_vm9, %v1795_v15, %v1796_v29  ;;  %v29_v63 = vld [vmem:[%s4793_s0 + $0x18] sm:$0xf]  ;;  %v1186_v43 = vshrl.u32 %v1009_v25, 16 }
  0xa3   :  { %883 = vrot.lane.b32.xlu0 %v787_v30, %s3091_s19  ;;  %1608 = vst.msk [vmem:[#allocation2 + $0x90] sm:$0xf] %vm1589_vm0, %v1530_v26  ;;  %v1417_v16 = vrot.slane %v1416_v0, 4  ;;  %v1189_v14 = vshll.u32 %v1009_v25, 16  ;;  %v1010_v26 = vld [vmem:[%s4793_s0 + $0x40] sm:$0xf]  ;;  %v1184_v23 = vsel %vm3237_vm13, %v1175_v24, %v1183_v62  ;;  %v268_v54 = vor.u32 %v267_v21, %v264_v19 }
  0xa4   :  { %v4029_v60 = vpop.f32.mrf.mxu1  ;;  %1886 = vst.msk [vmem:[#allocation2 + $0xac] sm:$0xf] %vm57_vm6, %v1797_v28  ;;  %v693_v45 = vld [vmem:[%s4793_s0 + $0x9c] sm:$0xe]  ;;  %v4105_v57 = vld [vmem:[%s4793_s0 + $0x40] sm:$0xf]  ;;  %v284_v8 = vsel %vm3165_vm5, %v4067_v27, %v4069_v5 }
  0xa5   :  { %v904_v6 = vpop.permute.xlu0 %903  ;;  %v1426_v46 = vsel %vm3237_vm13, %v1417_v16, %v4057_v53  ;;  %62 = vst.msk [vmem:[#allocation2 + $0x20] sm:$0xf] %vm57_vm6, %v29_v63  ;;  %v1188_v59 = vrot.slane %v1186_v43, 5  ;;  %v1191_v51 = vrot.slane %v1189_v14, 6  ;;  %v2762_v3 = vrot.slane %v693_v45, 9 }
  0xa6   :  { %981 = vst.msk [vmem:[#allocation2 + $0x98] sm:$0xf] %vm961_vm15, %v904_v6  ;;  %v1195_v6 = vshrl.u32 %v1010_v26, 16  ;;  %v132_v4 = vld [vmem:[%s4793_s0 + $0xa8] sm:$0xf]  ;;  %v487_v20 = vshll.u32 %v133_v37, 16 }
  0xa7   :  { %1609 = vst.msk [vmem:[#allocation2 + $0x98] sm:$0xf] %vm1589_vm0, %v1532_v48  ;;  %v848_v48 = vrot.slane %v846_v47, 4  ;;  %v269_v7 = vrot.slane %v268_v54, 4  ;;  %v134_v2 = vld [vmem:[%s4793_s0 + $0xb0] sm:$0x1]  ;;  %v1192_v16 = vor.u32 %v1191_v51, %v1188_v59 }
  0xa8   :  { %579 = vrot.lane.b32.xlu1 %v476_v61, %s3092_s26  ;;  %63 = vst.msk [vmem:[#allocation2 + $0x28] sm:$0xf] %vm57_vm6, %v30_v40  ;;  %v1198_v61 = vshll.u32 %v1010_v26, 16  ;;  %v3017_v10 = vld [vmem:[#allocation2 + $0xa4] sm:$0xf]  ;;  %v1197_v29 = vrot.slane %v1195_v6, 5 }
  0xa9   :  { %881 = vrot.lane.b32.xlu2 %v784_v38, %s3091_s19  ;;  %v850_v50 = vsel %vm3147_vm4, %v848_v48, %v849_v56  ;;  %v491_v38 = vshrl.u32 %v133_v37, 16  ;;  %v671_v15 = vld [vmem:[%s4793_s0 + $0x44] sm:$0x1]  ;;  %v790_v48 = vrot.slane %v4105_v57, 5  ;;  %v847_v56 = vsel %vm3147_vm4, %v2762_v3, %v846_v47  ;;  %v1036_v43 = vld [vmem:[%s4793_s0 + $0xa8] sm:$0xe] }
  0xaa   :  { %v532_v35 = vpop.permute.xlu1 %531  ;;  %v2855_v30 = vld [vmem:[#allocation2 + $0x90] sm:$0xf]  ;;  %v1500_v33 = vpop.permute.xlu2 %1499  ;;  %v478_v19 = vshrl.u32 %v132_v4, 16  ;;  %v481_v21 = vshll.u32 %v132_v4, 16  ;;  %v4135_v24 = vrot.slane %v487_v20, 5  ;;  %v497_v5 = vshll.u32 %v134_v2, 16 }
  0xab   :  { %577 = vrot.lane.b32.xlu0 %v466_v12, %s3092_s26  ;;  %625 = vst.msk [vmem:[#allocation2 + $0x18] sm:$0xf] %vm621_vm14, %v532_v35  ;;  %v2865_v39 = vld [vmem:[#allocation2 + $0xa8] sm:$0xf0]  ;;  %v1200_v35 = vrot.slane %v1198_v61, 6  ;;  %v493_v27 = vrot.slane %v491_v38, 4  ;;  %v274_v28 = vsel %vm3165_vm5, %v269_v7, %v4023_v1 }
  0xac   :  { %v4077_v11 = vpop.f32.mrf.mxu1  ;;  %v2868_v12 = vor.u32 %v3017_v10, %v2865_v39  ;;  %v1193_v36 = vrot.slane %v1192_v16, 4  ;;  %v792_v63 = vrot.slane %v790_v48, 4  ;;  %v1427_v1 = vrot.slane %v4057_v53, 4  ;;  %v47_v45 = vld [vmem:[%s4793_s0 + $0x84] sm:$0xf] }
  0xad   :  { %v530_v34 = vpop.permute.xlu0 %529  ;;  %v4143_v47 = vor.u32 %v1200_v35, %v1197_v29  ;;  %v494_v40 = vor.u32 %v493_v27, %v4135_v24  ;;  %v1438_v54 = vshrl.u32 %v1036_v43, 16  ;;  %80 = vst.msk [vmem:[#allocation2 + $0xb0] sm:$0xf] %vm57_vm6, %v47_v45  ;;  %v48_v59 = vld [vmem:[%s4793_s0 + $0x88] sm:$0xf]  ;;  %vm2631_vm1 = vcmask 1041409  }
  0xae   :  { %624 = vst.msk [vmem:[#allocation2 + $0x10] sm:$0xf] %vm621_vm14, %v530_v34  ;;  %v3016_v41 = vld [vmem:[#allocation2 + $0x94] sm:$0xf0]  ;;  %2959 = vmatmul.msk.bf16.gmra.mxu2 %vm2153_vm10, %v2868_v12  ;;  %v793_v34 = vrot.slane %v671_v15, 5  ;;  %vm2634_vm2 = vcmask 1042434  }
  0xaf   :  { %964 = vst.msk [vmem:[#allocation2 + $0x10] sm:$0xf] %vm961_vm15, %v870_v58  ;;  %v2856_v44 = vor.u32 %v3016_v41, %v2855_v30  ;;  %v1035_v58 = vld [vmem:[%s4793_s0 + $0xa4] sm:$0x3]  ;;  %v4155_v41 = vrot.slane %v497_v5, 5  ;;  %v1202_v53 = vsel %vm3237_vm13, %v1193_v36, %v4143_v47  ;;  %v1440_v39 = vrot.slane %v1438_v54, 5 }
  0xb0   :  { %1545 = vrot.lane.b32.xlu1 %v1426_v46, %s3093_s29  ;;  %v1429_v55 = vshrl.u32 %v1035_v58, 16  ;;  %v1432_v52 = vshll.u32 %v1035_v58, 16  ;;  %v483_v46 = vrot.slane %v481_v21, 5  ;;  %v1441_v58 = vshll.u32 %v1036_v43, 16  ;;  %v1037_v6 = vld [vmem:[%s4793_s0 + $0xac] sm:$0xf] }
  0xb1   :  { %2255 = vmatmul.bf16.gmra.mxu3 %v2856_v44  ;;  %1511 = vrot.lane.b32.xlu2 %v1184_v23, %s3093_s29  ;;  %v4160_v23 = vld [vmem:[%s4793_s0 + $0xac] sm:$0xf]  ;;  %v794_v20 = vsel %vm3147_vm4, %v792_v63, %v793_v34  ;;  %81 = vst.msk [vmem:[#allocation2 + $0xb8] sm:$0xf] %vm57_vm6, %v48_v59  ;;  %v108_v12 = vld [vmem:[%s4793_s0 + $0x48] sm:$0xf] }
  0xb2   :  { %v1498_v0 = vpop.permute.xlu1 %1497  ;;  %v906_v9 = vpop.permute.xlu2 %905  ;;  %v1431_v25 = vrot.slane %v1429_v55, 5  ;;  %v1434_v62 = vrot.slane %v1432_v52, 6  ;;  %v853_v3 = vrot.slane %v4160_v23, 5  ;;  %v109_v4 = vld [vmem:[%s4793_s0 + $0x4c] sm:$0xf]  ;;  %v1443_v7 = vrot.slane %v1441_v58, 6 }
  0xb3   :  { %919 = vrot.lane.b32.xlu0 %v850_v50, %s3091_s19  ;;  %1592 = vst.msk [vmem:[#allocation2 + $0x10] sm:$0xf] %vm1589_vm0, %v1498_v0  ;;  %v495_v0 = vrot.slane %v494_v40, 4  ;;  %v669_v55 = vld [vmem:[%s4793_s0 + $0x3c] sm:$0xe]  ;;  %v299_v15 = vshrl.u32 %v109_v4, 16 }
  0xb4   :  { %v4124_v49 = vpop.f32.mrf.mxu1  ;;  %v1435_v14 = vor.u32 %v1434_v62, %v1431_v25  ;;  %v1011_v52 = vld [vmem:[%s4793_s0 + $0x44] sm:$0x3]  ;;  %v1656_v16 = vld [vmem:[%s4793_s0 + $0x88] sm:$0xf]  ;;  %v2754_v29 = vrot.slane %v669_v55, 9  ;;  %v4214_v27 = vrot.slane %v853_v3, 4 }
  0xb5   :  { %v872_v31 = vpop.permute.xlu0 %871  ;;  %v1205_v35 = vshrl.u32 %v1011_v52, 16  ;;  %v500_v21 = vsel %vm3165_vm5, %v495_v0, %v4155_v41  ;;  %v4210_v62 = vld [vmem:[%s4793_s0 + $0xb0] sm:$0x1]  ;;  %v1800_v5 = vrot.slane %v1656_v16, 6  ;;  %v289_v43 = vshll.u32 %v108_v12, 16 }
  0xb6   :  { %965 = vst.msk [vmem:[#allocation2 + $0x18] sm:$0xf] %vm961_vm15, %v872_v31  ;;  %v1436_v10 = vsel %vm3237_vm13, %v1427_v1, %v1435_v14  ;;  %v295_v31 = vshll.u32 %v109_v4, 16  ;;  %v301_v14 = vrot.slane %v299_v15, 4  ;;  %v791_v41 = vsel %vm3147_vm4, %v2754_v29, %v790_v48  ;;  %v1012_v57 = vld [vmem:[%s4793_s0 + $0x48] sm:$0xe] }
  0xb7   :  { %1593 = vst.msk [vmem:[#allocation2 + $0x18] sm:$0xf] %vm1589_vm0, %v1500_v33  ;;  %v480_v33 = vrot.slane %v478_v19, 4  ;;  %v856_v54 = vrot.slane %v4210_v62, 5  ;;  %v1657_v48 = vld [vmem:[%s4793_s0 + $0x8c] sm:$0x3] }
  0xb8   :  { %547 = vrot.lane.b32.xlu1 %v284_v8, %s3092_s26  ;;  %v1447_v8 = vshrl.u32 %v1037_v6, 16  ;;  %v4222_v1 = vrot.slane %v295_v31, 5  ;;  %v1802_v58 = vrot.slane %v1800_v5, 4  ;;  %v1203_v0 = vrot.slane %v4143_v47, 4  ;;  %v1013_v47 = vld [vmem:[%s4793_s0 + $0x4c] sm:$0xf] }
  0xb9   :  { %917 = vrot.lane.b32.xlu2 %v847_v56, %s3091_s19  ;;  %v484_v38 = vor.u32 %v483_v46, %v480_v33  ;;  %v1208_v56 = vshll.u32 %v1011_v52, 16  ;;  %v286_v33 = vshrl.u32 %v108_v12, 16  ;;  %v1655_v46 = vld [vmem:[%s4793_s0 + $0x84] sm:$0xc]  ;;  %v1214_v55 = vshrl.u32 %v1012_v57, 16 }
  0xba   :  { %v568_v30 = vpop.permute.xlu1 %567  ;;  %v2791_v26 = vld [vmem:[#allocation2 + $0x10] sm:$0xf]  ;;  %v1536_v44 = vpop.permute.xlu2 %1535  ;;  %v1449_v63 = vrot.slane %v1447_v8, 5  ;;  %v2776_v40 = vrot.slane %v1655_v46, 10  ;;  %v302_v4 = vor.u32 %v301_v14, %v4222_v1  ;;  %v1217_v52 = vshll.u32 %v1012_v57, 16 }
  0xbb   :  { %545 = vrot.lane.b32.xlu0 %v274_v28, %s3092_s26  ;;  %643 = vst.msk [vmem:[#allocation2 + $0xa8] sm:$0xf] %vm621_vm14, %v568_v30  ;;  %v485_v19 = vrot.slane %v484_v38, 4  ;;  %v1444_v30 = vor.u32 %v1443_v7, %v1440_v39  ;;  %v1210_v45 = vrot.slane %v1208_v56, 6  ;;  %v135_v39 = vld [vmem:[%s4793_s0 + $0xb4] sm:$0xf] }
  0xbc   :  { %v4165_v50 = vpop.f32.mrf.mxu1  ;;  %v136_v16 = vld [vmem:[%s4793_s0 + $0xb8] sm:$0xf]  ;;  %v32_v29 = vld [vmem:[%s4793_s0 + $0x28] sm:$0xf]  ;;  %v502_v56 = vshrl.u32 %v135_v39, 16  ;;  %v1219_v46 = vrot.slane %v1217_v52, 6 }
  0xbd   :  { %v566_v37 = vpop.permute.xlu0 %565  ;;  %v1445_v59 = vrot.slane %v1444_v30, 4  ;;  %v696_v30 = vld [vmem:[%s4793_s0 + $0xa8] sm:$0xe]  ;;  %65 = vst.msk [vmem:[#allocation2 + $0x38] sm:$0xf] %vm57_vm6, %v32_v29  ;;  %v1226_v14 = vshll.u32 %v1013_v47, 16 }
  0xbe   :  { %642 = vst.msk [vmem:[#allocation2 + $0xa0] sm:$0xf] %vm621_vm14, %v566_v37  ;;  %v3000_v51 = vld [vmem:[#allocation2 + $0x14] sm:$0xf0]  ;;  %v110_v37 = vld [vmem:[%s4793_s0 + $0x50] sm:$0x1] }
  0xbf   :  { %982 = vst.msk [vmem:[#allocation2 + $0xa0] sm:$0xf] %vm961_vm15, %v906_v9  ;;  %v2792_v61 = vor.u32 %v3000_v51, %v2791_v26  ;;  %v1450_v9 = vshll.u32 %v1037_v6, 16  ;;  %v1207_v26 = vrot.slane %v1205_v35, 5  ;;  %v1803_v6 = vrot.slane %v1657_v48, 6 }
  0xc0   :  { %1513 = vrot.lane.b32.xlu1 %v1202_v53, %s3093_s29  ;;  %v490_v53 = vsel %vm3165_vm5, %v485_v19, %v4135_v24  ;;  %v288_v24 = vrot.slane %v286_v33, 4  ;;  %v505_v19 = vshll.u32 %v135_v39, 16  ;;  %v1216_v33 = vrot.slane %v1214_v55, 5  ;;  %v137_v39 = vld [vmem:[%s4793_s0 + $0xbc] sm:$0x1] }
  0xc1   :  { %2215 = vmatmul.bf16.gmra.mxu0 %v2792_v61  ;;  %1547 = vrot.lane.b32.xlu2 %v1436_v10, %s3093_s29  ;;  %v1452_v34 = vrot.slane %v1450_v9, 6  ;;  %v291_v10 = vrot.slane %v289_v43, 5  ;;  %v1211_v38 = vor.u32 %v1210_v45, %v1207_v26  ;;  %v1804_v7 = vsel %vm3181_vm9, %v1802_v58, %v1803_v6 }
  0xc2   :  { %v1534_v2 = vpop.permute.xlu1 %1533  ;;  %1888 = vst.msk [vmem:[#allocation2 + $0xbc] sm:$0xf] %vm57_vm6, %v1804_v7  ;;  %v1223_v43 = vshrl.u32 %v1013_v47, 16  ;;  %v1220_v6 = vor.u32 %v1219_v46, %v1216_v33  ;;  %v521_v29 = vshll.u32 %v137_v39, 16  ;;  %vm2637_vm3 = vcmask 1043459  }
  0xc3   :  { %887 = vrot.lane.b32.xlu0 %v794_v20, %s3091_s19  ;;  %1610 = vst.msk [vmem:[#allocation2 + $0xa0] sm:$0xf] %vm1589_vm0, %v1534_v2  ;;  %v874_v25 = vpop.permute.xlu2 %873  ;;  %v4245_v51 = vor.u32 %v1452_v34, %v1449_v63  ;;  %v305_v20 = vshll.u32 %v110_v37, 16  ;;  %v31_v2 = vld [vmem:[%s4793_s0 + $0x24] sm:$0xf]  ;;  %v1212_v62 = vsel %vm3237_vm13, %v1203_v0, %v1211_v38  ;;  %v857_v63 = vsel %vm3147_vm4, %v4214_v27, %v856_v54 }
  0xc4   :  { %v4216_v36 = vpop.f32.mrf.mxu1  ;;  %64 = vst.msk [vmem:[#allocation2 + $0x30] sm:$0xf] %vm57_vm6, %v31_v2  ;;  %v292_v34 = vor.u32 %v291_v10, %v288_v24  ;;  %v4296_v27 = vld [vmem:[%s4793_s0 + $0x4c] sm:$0xf]  ;;  %v2763_v37 = vrot.slane %v696_v30, 9  ;;  %v507_v54 = vrot.slane %v505_v19, 5 }
  0xc5   :  { %v908_v28 = vpop.permute.xlu0 %907  ;;  %v1454_v15 = vsel %vm3237_vm13, %v1445_v59, %v4245_v51  ;;  %v797_v52 = vrot.slane %v4296_v27, 5  ;;  %vm2649_vm7 = vcmask 1047559  }
  0xc6   :  { %983 = vst.msk [vmem:[#allocation2 + $0xa8] sm:$0xf] %vm961_vm15, %v908_v28  ;;  %v307_v28 = vrot.slane %v305_v20, 5  ;;  %v293_v58 = vrot.slane %v292_v34, 4  ;;  %v1228_v20 = vrot.slane %v1226_v14, 6  ;;  %v854_v7 = vsel %vm3147_vm4, %v2763_v37, %v853_v3 }
  0xc7   :  { %1611 = vst.msk [vmem:[#allocation2 + $0xa8] sm:$0xf] %vm1589_vm0, %v1536_v44  ;;  %v1801_v44 = vsel %vm3181_vm9, %v2776_v40, %v1800_v5  ;;  %v303_v5 = vrot.slane %v302_v4, 4  ;;  %v511_v40 = vshll.u32 %v136_v16, 16  ;;  %v1225_v4 = vrot.slane %v1223_v43, 5 }
  0xc8   :  { %583 = vrot.lane.b32.xlu1 %v500_v21, %s3092_s26  ;;  %1887 = vst.msk [vmem:[#allocation2 + $0xb4] sm:$0xf] %vm57_vm6, %v1801_v44  ;;  %v1039_v3 = vld [vmem:[%s4793_s0 + $0xb4] sm:$0xe]  ;;  %v49_v34 = vld [vmem:[%s4793_s0 + $0x90] sm:$0xf] }
  0xc9   :  { %885 = vrot.lane.b32.xlu2 %v791_v41, %s3091_s19  ;;  %v515_v41 = vshrl.u32 %v136_v16, 16  ;;  %v2873_v44 = vld [vmem:[#allocation2 + $0xb8] sm:$0xf0]  ;;  %v308_v59 = vsel %vm3165_vm5, %v303_v5, %v307_v28  ;;  %v4304_v38 = vrot.slane %v511_v40, 5  ;;  %v1221_v16 = vrot.slane %v1220_v6, 4 }
  0xca   :  { %v536_v61 = vpop.permute.xlu1 %535  ;;  %v2863_v8 = vld [vmem:[#allocation2 + $0xa0] sm:$0xf]  ;;  %v1466_v30 = vshrl.u32 %v1039_v3, 16  ;;  %v523_v14 = vrot.slane %v521_v29, 5  ;;  %82 = vst.msk [vmem:[#allocation2 + $0xc0] sm:$0xf] %vm57_vm6, %v49_v34 }
  0xcb   :  { %581 = vrot.lane.b32.xlu0 %v490_v53, %s3092_s26  ;;  %627 = vst.msk [vmem:[#allocation2 + $0x28] sm:$0xf] %vm621_vm14, %v536_v61  ;;  %v1504_v9 = vpop.permute.xlu2 %1503  ;;  %v504_v53 = vrot.slane %v502_v56, 4  ;;  %v517_v55 = vrot.slane %v515_v41, 4  ;;  %v1040_v41 = vld [vmem:[%s4793_s0 + $0xb8] sm:$0xf] }
  0xcc   :  { %v4265_v31 = vpop.f32.mrf.mxu1  ;;  %v672_v37 = vld [vmem:[%s4793_s0 + $0x48] sm:$0xe]  ;;  %v1659_v6 = vld [vmem:[%s4793_s0 + $0x94] sm:$0xf] }
  0xcd   :  { %v534_v12 = vpop.permute.xlu0 %533  ;;  %v518_v23 = vor.u32 %v517_v55, %v4304_v38  ;;  %v1807_v39 = vrot.slane %v1659_v6, 6 }
  0xce   :  { %626 = vst.msk [vmem:[#allocation2 + $0x20] sm:$0xf] %vm621_vm14, %v534_v12  ;;  %v3018_v35 = vld [vmem:[#allocation2 + $0xa4] sm:$0xf0]  ;;  %v298_v12 = vsel %vm3165_vm5, %v293_v58, %v4222_v1  ;;  %v799_v1 = vrot.slane %v797_v52, 4 }
  0xcf   :  { %966 = vst.msk [vmem:[#allocation2 + $0x20] sm:$0xf] %vm961_vm15, %v874_v25  ;;  %v2864_v21 = vor.u32 %v3018_v35, %v2863_v8  ;;  %v1038_v25 = vld [vmem:[%s4793_s0 + $0xb0] sm:$0x3]  ;;  %v3019_v26 = vld [vmem:[#allocation2 + $0xb4] sm:$0xf]  ;;  %v508_v8 = vor.u32 %v507_v54, %v504_v53 }
  0xd0   :  { %1549 = vrot.lane.b32.xlu1 %v1454_v15, %s3093_s29  ;;  %v1457_v57 = vshrl.u32 %v1038_v25, 16  ;;  %v1460_v48 = vshll.u32 %v1038_v25, 16  ;;  %v2876_v61 = vor.u32 %v3019_v26, %v2873_v44  ;;  %v674_v15 = vld [vmem:[%s4793_s0 + $0x50] sm:$0x1]  ;;  %v519_v43 = vrot.slane %v518_v23, 4 }
  0xd1   :  { %2260 = vmatmul.bf16.gmra.mxu3 %v2864_v21  ;;  %1515 = vrot.lane.b32.xlu2 %v1212_v62, %s3093_s29  ;;  %v800_v56 = vrot.slane %v674_v15, 5  ;;  %v4335_v19 = vrot.slane %v508_v8, 4  ;;  %v1455_v21 = vrot.slane %v4245_v51, 4  ;;  %v50_v51 = vld [vmem:[%s4793_s0 + $0x94] sm:$0xf] }
  0xd2   :  { %v1502_v45 = vpop.permute.xlu1 %1501  ;;  %2960 = vmatmul.msk.bf16.gmra.mxu2 %vm2153_vm10, %v2876_v61  ;;  %v1459_v47 = vrot.slane %v1457_v57, 5  ;;  %v1462_v2 = vrot.slane %v1460_v48, 6  ;;  %v112_v53 = vld [vmem:[%s4793_s0 + $0x58] sm:$0xf]  ;;  %v1468_v57 = vrot.slane %v1466_v30, 5 }
  0xd3   :  { %923 = vrot.lane.b32.xlu0 %v857_v63, %s3091_s19  ;;  %1594 = vst.msk [vmem:[#allocation2 + $0x20] sm:$0xf] %vm1589_vm0, %v1502_v45  ;;  %v910_v24 = vpop.permute.xlu2 %909  ;;  %v1469_v63 = vshll.u32 %v1039_v3, 16  ;;  %v801_v54 = vsel %vm3147_vm4, %v799_v1, %v800_v56  ;;  %v1014_v44 = vld [vmem:[%s4793_s0 + $0x50] sm:$0x3]  ;;  %v323_v55 = vshrl.u32 %v112_v53, 16 }
  0xd4   :  { %v4302_v0 = vpop.f32.mrf.mxu1  ;;  %v1463_v62 = vor.u32 %v1462_v2, %v1459_v47  ;;  %83 = vst.msk [vmem:[#allocation2 + $0xc8] sm:$0xf] %vm57_vm6, %v50_v51  ;;  %v4375_v58 = vld [vmem:[%s4793_s0 + $0xb8] sm:$0xf]  ;;  %v1233_v8 = vshrl.u32 %v1014_v44, 16  ;;  %v1236_v47 = vshll.u32 %v1014_v44, 16 }
  0xd5   :  { %v876_v10 = vpop.permute.xlu0 %875  ;;  %v1471_v48 = vrot.slane %v1469_v63, 6  ;;  %v1658_v2 = vld [vmem:[%s4793_s0 + $0x90] sm:$0xc]  ;;  %v860_v15 = vrot.slane %v4375_v58, 5  ;;  %v1660_v23 = vld [vmem:[%s4793_s0 + $0x98] sm:$0x3] }
  0xd6   :  { %967 = vst.msk [vmem:[#allocation2 + $0x28] sm:$0xf] %vm961_vm15, %v876_v10  ;;  %v1464_v45 = vsel %vm3237_vm13, %v1455_v21, %v1463_v62  ;;  %v2755_v10 = vrot.slane %v672_v37, 9  ;;  %v2777_v29 = vrot.slane %v1658_v2, 10  ;;  %v1809_v3 = vrot.slane %v1807_v39, 4 }
  0xd7   :  { %1595 = vst.msk [vmem:[#allocation2 + $0x28] sm:$0xf] %vm1589_vm0, %v1504_v9  ;;  %v4324_v9 = vor.u32 %v1228_v20, %v1225_v4  ;;  %v111_v4 = vld [vmem:[%s4793_s0 + $0x54] sm:$0xf]  ;;  %v319_v20 = vshll.u32 %v112_v53, 16  ;;  %v1810_v63 = vrot.slane %v1660_v23, 6 }
  0xd8   :  { %551 = vrot.lane.b32.xlu1 %v308_v59, %s3092_s26  ;;  %v1475_v59 = vshrl.u32 %v1040_v41, 16  ;;  %v701_v56 = vld [vmem:[%s4793_s0 + $0xbc] sm:$0x1]  ;;  %v313_v34 = vshll.u32 %v111_v4, 16  ;;  %v1235_v51 = vrot.slane %v1233_v8, 5  ;;  %v862_v53 = vrot.slane %v860_v15, 4 }
  0xd9   :  { %921 = vrot.lane.b32.xlu2 %v854_v7, %s3091_s19  ;;  %v1230_v25 = vsel %vm3237_vm13, %v1221_v16, %v4324_v9  ;;  %v524_v7 = vsel %vm3165_vm5, %v519_v43, %v523_v14  ;;  %v1472_v16 = vor.u32 %v1471_v48, %v1468_v57  ;;  %v113_v30 = vld [vmem:[%s4793_s0 + $0x5c] sm:$0x1]  ;;  %v1808_v43 = vsel %vm3181_vm9, %v2777_v29, %v1807_v39  ;;  %v699_v29 = vld [vmem:[%s4793_s0 + $0xb4] sm:$0xe] }
  0xda   :  { %v572_v35 = vpop.permute.xlu1 %571  ;;  %v2799_v5 = vld [vmem:[#allocation2 + $0x20] sm:$0xf]  ;;  %v1477_v21 = vrot.slane %v1475_v59, 5  ;;  %v798_v14 = vsel %vm3147_vm4, %v2755_v10, %v797_v52  ;;  %v1811_v27 = vsel %vm3181_vm9, %v1809_v3, %v1810_v63  ;;  %1889 = vst.msk [vmem:[#allocation2 + $0xc4] sm:$0xf] %vm57_vm6, %v1808_v43  ;;  %v315_v48 = vrot.slane %v313_v34, 5 }
  0xdb   :  { %549 = vrot.lane.b32.xlu0 %v298_v12, %s3092_s26  ;;  %645 = vst.msk [vmem:[#allocation2 + $0xb8] sm:$0xf] %vm621_vm14, %v572_v35  ;;  %v4338_v28 = vpop.permute.xlu2 %1539  ;;  %v1473_v52 = vrot.slane %v1472_v16, 4  ;;  %v1231_v44 = vrot.slane %v4324_v9, 4  ;;  %v1016_v9 = vld [vmem:[%s4793_s0 + $0x58] sm:$0xf] }
  0xdc   :  { %v4343_v46 = vpop.f32.mrf.mxu1  ;;  %1890 = vst.msk [vmem:[#allocation2 + $0xcc] sm:$0xf] %vm57_vm6, %v1811_v27  ;;  %v676_v27 = vld [vmem:[%s4793_s0 + $0x58] sm:$0xf] }
  0xdd   :  { %v570_v33 = vpop.permute.xlu0 %569 }
  0xde   :  { %644 = vst.msk [vmem:[#allocation2 + $0xb0] sm:$0xf] %vm621_vm14, %v570_v33  ;;  %v3002_v40 = vld [vmem:[#allocation2 + $0x24] sm:$0xf0]  ;;  %v4404_v33 = vrot.slane %v319_v20, 5 }
  0xdf   :  { %984 = vst.msk [vmem:[#allocation2 + $0xb0] sm:$0xf] %vm961_vm15, %v910_v24  ;;  %v2800_v26 = vor.u32 %v3002_v40, %v2799_v5  ;;  %v1478_v24 = vshll.u32 %v1040_v41, 16  ;;  %v310_v5 = vshrl.u32 %v111_v4, 16  ;;  %v1238_v40 = vrot.slane %v1236_v47, 6 }
  0xe0   :  { %1517 = vrot.lane.b32.xlu1 %v1230_v25, %s3093_s29  ;;  %v325_v25 = vrot.slane %v323_v55, 4  ;;  %v1015_v41 = vld [vmem:[%s4793_s0 + $0x54] sm:$0xe]  ;;  %v33_v4 = vld [vmem:[%s4793_s0 + $0x30] sm:$0xf] }
  0xe1   :  { %2220 = vmatmul.bf16.gmra.mxu0 %v2800_v26  ;;  %1551 = vrot.lane.b32.xlu2 %v1464_v45, %s3093_s29  ;;  %v1480_v62 = vrot.slane %v1478_v24, 6  ;;  %v514_v26 = vsel %vm3165_vm5, %v4335_v19, %v4304_v38  ;;  %v329_v45 = vshll.u32 %v113_v30, 16  ;;  %v1242_v19 = vshrl.u32 %v1015_v41, 16  ;;  %66 = vst.msk [vmem:[#allocation2 + $0x40] sm:$0xf] %vm57_vm6, %v33_v4 }
  0xe2   :  { %v1538_v61 = vpop.permute.xlu1 %1537  ;;  %v326_v38 = vor.u32 %v325_v25, %v4404_v33  ;;  %v312_v57 = vrot.slane %v310_v5, 4  ;;  %v1239_v59 = vor.u32 %v1238_v40, %v1235_v51  ;;  %v1245_v10 = vshll.u32 %v1015_v41, 16  ;;  %v3021_v3 = vld [vmem:[#allocation2 + $0xc4] sm:$0xf] }
  0xe3   :  { %891 = vrot.lane.b32.xlu0 %v801_v54, %s3091_s19  ;;  %1612 = vst.msk [vmem:[#allocation2 + $0xb0] sm:$0xf] %vm1589_vm0, %v1538_v61  ;;  %v878_v12 = vpop.permute.xlu2 %877  ;;  %v863_v54 = vrot.slane %v701_v56, 5  ;;  %v331_v61 = vrot.slane %v329_v45, 5  ;;  %v1244_v2 = vrot.slane %v1242_v19, 5  ;;  %v1251_v5 = vshrl.u32 %v1016_v9, 16 }
  0xe4   :  { %v4395_v1 = vpop.f32.mrf.mxu1  ;;  %v327_v47 = vrot.slane %v326_v38, 4  ;;  %v1240_v23 = vsel %vm3237_vm13, %v1231_v44, %v1239_v59  ;;  %v316_v56 = vor.u32 %v315_v48, %v312_v57  ;;  %v1254_v30 = vshll.u32 %v1016_v9, 16  ;;  %v677_v44 = vld [vmem:[%s4793_s0 + $0x5c] sm:$0x1] }
  0xe5   :  { %v912_v35 = vpop.permute.xlu0 %911  ;;  %v2764_v25 = vrot.slane %v699_v29, 9  ;;  %v804_v48 = vrot.slane %v676_v27, 5  ;;  %v51_v9 = vld [vmem:[%s4793_s0 + $0x9c] sm:$0xf] }
  0xe6   :  { %985 = vst.msk [vmem:[#allocation2 + $0xb8] sm:$0xf] %vm961_vm15, %v912_v35  ;;  %v864_v35 = vsel %vm3147_vm4, %v862_v53, %v863_v54  ;;  %v317_v51 = vrot.slane %v316_v56, 4  ;;  %v332_v45 = vsel %vm3165_vm5, %v327_v47, %v331_v61  ;;  %v1256_v53 = vrot.slane %v1254_v30, 6  ;;  %v1663_v30 = vld [vmem:[%s4793_s0 + $0xa4] sm:$0x3] }
  0xe7   :  { %1613 = vst.msk [vmem:[#allocation2 + $0xb8] sm:$0xf] %vm1589_vm0, %v4338_v28  ;;  %v4425_v28 = vor.u32 %v1480_v62, %v1477_v21  ;;  %v1041_v21 = vld [vmem:[%s4793_s0 + $0xbc] sm:$0x3]  ;;  %v1247_v62 = vrot.slane %v1245_v10, 6  ;;  %v861_v54 = vsel %vm3147_vm4, %v2764_v25, %v860_v15  ;;  %v807_v61 = vrot.slane %v677_v44, 5 }
  0xe8   :  { %587 = vrot.lane.b32.xlu1 %v524_v7, %s3092_s26  ;;  %v34_v7 = vld [vmem:[%s4793_s0 + $0x34] sm:$0xf]  ;;  %v1485_v43 = vshrl.u32 %v1041_v21, 16  ;;  %v322_v57 = vsel %vm3165_vm5, %v317_v51, %v4404_v33  ;;  %84 = vst.msk [vmem:[#allocation2 + $0xd0] sm:$0xf] %vm57_vm6, %v51_v9  ;;  %vm2643_vm5 = vcmask 1045509  }
  0xe9   :  { %889 = vrot.lane.b32.xlu2 %v798_v14, %s3091_s19  ;;  %v1482_v39 = vsel %vm3237_vm13, %v1473_v52, %v4425_v28  ;;  %67 = vst.msk [vmem:[#allocation2 + $0x48] sm:$0xf] %vm57_vm6, %v34_v7  ;;  %v1488_v14 = vshll.u32 %v1041_v21, 16  ;;  %v1248_v52 = vor.u32 %v1247_v62, %v1244_v2  ;;  %v1483_v22 = vrot.slane %v4425_v28, 4  ;;  %v52_v28 = vld [vmem:[%s4793_s0 + $0xa0] sm:$0xf] }
  0xea   :  { %v540_v37 = vpop.permute.xlu1 %539  ;;  %v2871_v24 = vld [vmem:[#allocation2 + $0xb0] sm:$0xf]  ;;  %v1487_v38 = vrot.slane %v1485_v43, 5  ;;  %v675_v2 = vld [vmem:[%s4793_s0 + $0x54] sm:$0xe] }
  0xeb   :  { %585 = vrot.lane.b32.xlu0 %v514_v26, %s3092_s26  ;;  %629 = vst.msk [vmem:[#allocation2 + $0x38] sm:$0xf] %vm621_vm14, %v540_v37  ;;  %v1508_v6 = vpop.permute.xlu2 %1507  ;;  %v1253_v37 = vrot.slane %v1251_v5, 5  ;;  %v1490_v19 = vrot.slane %v1488_v14, 6  ;;  %v1249_v59 = vrot.slane %v1248_v52, 4  ;;  %v1817_v14 = vrot.slane %v1663_v30, 6 }
  0xec   :  { %v4438_v55 = vpop.f32.mrf.mxu1  ;;  %85 = vst.msk [vmem:[#allocation2 + $0xd8] sm:$0xf] %vm57_vm6, %v52_v28  ;;  %v1661_v5 = vld [vmem:[%s4793_s0 + $0x9c] sm:$0xc]  ;;  %v36_v44 = vld [vmem:[%s4793_s0 + $0x40] sm:$0xf] }
  0xed   :  { %v538_v20 = vpop.permute.xlu0 %537  ;;  %v1491_v15 = vor.u32 %v1490_v19, %v1487_v38  ;;  %v2778_v25 = vrot.slane %v1661_v5, 10  ;;  %69 = vst.msk [vmem:[#allocation2 + $0x58] sm:$0xf] %vm57_vm6, %v36_v44  ;;  %v4570_v28 = vld [vmem:[%s4796_s3] sm:$0xff]  ;;  %v1665_v30 = vld [vmem:[%s4793_s0 + $0xac] sm:$0xf] }
  0xee   :  { %628 = vst.msk [vmem:[#allocation2 + $0x30] sm:$0xf] %vm621_vm14, %v538_v20  ;;  %v3020_v8 = vld [vmem:[#allocation2 + $0xb4] sm:$0xf0] }
  0xef   :  { %968 = vst.msk [vmem:[#allocation2 + $0x30] sm:$0xf] %vm961_vm15, %v878_v12  ;;  %v2872_v16 = vor.u32 %v3020_v8, %v2871_v24  ;;  %v2881_v12 = vld [vmem:[#allocation2 + $0xc8] sm:$0xf0]  ;;  %v4488_v24 = vor.u32 %v1256_v53, %v1253_v37  ;;  %v1492_v47 = vsel %vm3237_vm13, %v1483_v22, %v1491_v15 }
  0xf0   :  { %1553 = vrot.lane.b32.xlu1 %v1482_v39, %s3093_s29  ;;  %v2884_v63 = vor.u32 %v3021_v3, %v2881_v12  ;;  %v2756_v3 = vrot.slane %v675_v2, 9  ;;  %v4575_v2 = vld [vmem:[%s4796_s3 + $0x8] sm:$0xff] }
  0xf1   :  { %2265 = vmatmul.bf16.gmra.mxu3 %v2872_v16  ;;  %1519 = vrot.lane.b32.xlu2 %v1240_v23, %s3093_s29  ;;  %v1258_v39 = vsel %vm3237_vm13, %v1249_v59, %v4488_v24  ;;  %v1017_v23 = vld [vmem:[%s4793_s0 + $0x5c] sm:$0x3]  ;;  %v1259_v13 = vrot.slane %v4488_v24, 4 }
  0xf2   :  { %v1506_v34 = vpop.permute.xlu1 %1505  ;;  %2961 = vmatmul.msk.bf16.gmra.mxu2 %vm2153_vm10, %v2884_v63  ;;  %v1261_v56 = vshrl.u32 %v1017_v23, 16  ;;  %v1264_v21 = vshll.u32 %v1017_v23, 16  ;;  %v805_v51 = vsel %vm3147_vm4, %v2756_v3, %v804_v48 }
  0xf3   :  { %927 = vrot.lane.b32.xlu0 %v864_v35, %s3091_s19  ;;  %1596 = vst.msk [vmem:[#allocation2 + $0x30] sm:$0xf] %vm1589_vm0, %v1506_v34  ;;  %v914_v40 = vpop.permute.xlu2 %913  ;;  %v1662_v35 = vld [vmem:[%s4793_s0 + $0xa0] sm:$0xf] }
  0xf4   :  { %v4468_v26 = vpop.f32.mrf.mxu1  ;;  %v1814_v12 = vrot.slane %v1662_v35, 6  ;;  %v54_v35 = vld [vmem:[%s4793_s0 + $0xac] sm:$0xf] }
  0xf5   :  { %v880_v41 = vpop.permute.xlu0 %879  ;;  %87 = vst.msk [vmem:[#allocation2 + $0xe8] sm:$0xf] %vm57_vm6, %v54_v35 }
  0xf6   :  { %969 = vst.msk [vmem:[#allocation2 + $0x38] sm:$0xf] %vm961_vm15, %v880_v41  ;;  %v1816_v43 = vrot.slane %v1814_v12, 4  ;;  %v1266_v41 = vrot.slane %v1264_v21, 6 }
  0xf7   :  { %1597 = vst.msk [vmem:[#allocation2 + $0x38] sm:$0xf] %vm1589_vm0, %v1508_v6  ;;  %v806_v6 = vrot.slane %v804_v48, 4 }
  0xf8   :  { %555 = vrot.lane.b32.xlu1 %v332_v45, %s3092_s26  ;;  %v1815_v45 = vsel %vm3181_vm9, %v2778_v25, %v1814_v12  ;;  %v1818_v27 = vsel %vm3181_vm9, %v1816_v43, %v1817_v14  ;;  %v1821_v25 = vrot.slane %v1665_v30, 6  ;;  %v1664_v14 = vld [vmem:[%s4793_s0 + $0xa8] sm:$0xc] }
  0xf9   :  { %925 = vrot.lane.b32.xlu2 %v861_v54, %s3091_s19  ;;  %v808_v16 = vsel %vm3147_vm4, %v806_v6, %v807_v61  ;;  %1891 = vst.msk [vmem:[#allocation2 + $0xd4] sm:$0xf] %vm57_vm6, %v1815_v45  ;;  %v2779_v45 = vrot.slane %v1664_v14, 10  ;;  %vm2640_vm4 = vcmask 1044484  }
  0xfa   :  { %v576_v58 = vpop.permute.xlu1 %575  ;;  %v2807_v33 = vld [vmem:[#allocation2 + $0x30] sm:$0xf]  ;;  %1892 = vst.msk [vmem:[#allocation2 + $0xdc] sm:$0xf] %vm57_vm6, %v1818_v27  ;;  %v1823_v27 = vrot.slane %v1821_v25, 4 }
  0xfb   :  { %553 = vrot.lane.b32.xlu0 %v322_v57, %s3092_s26  ;;  %647 = vst.msk [vmem:[#allocation2 + $0xc8] sm:$0xf] %vm621_vm14, %v576_v58  ;;  %v1544_v10 = vpop.permute.xlu2 %1543  ;;  %v35_v57 = vld [vmem:[%s4793_s0 + $0x3c] sm:$0xf] }
  0xfc   :  { %v4494_v20 = vpop.f32.mrf.mxu1  ;;  %68 = vst.msk [vmem:[#allocation2 + $0x50] sm:$0xf] %vm57_vm6, %v35_v57 }
  0xfd   :  { %v574_v4 = vpop.permute.xlu0 %573 }
  0xfe   :  { %646 = vst.msk [vmem:[#allocation2 + $0xc0] sm:$0xf] %vm621_vm14, %v574_v4  ;;  %v3004_v7 = vld [vmem:[#allocation2 + $0x34] sm:$0xf0] }
  0xff   :  { %986 = vst.msk [vmem:[#allocation2 + $0xc0] sm:$0xf] %vm961_vm15, %v914_v40  ;;  %v2808_v8 = vor.u32 %v3004_v7, %v2807_v33  ;;  %v1263_v40 = vrot.slane %v1261_v56, 5 }
 0x100   :  { %1521 = vrot.lane.b32.xlu1 %v1258_v39, %s3093_s29  ;;  %v3023_v58 = vld [vmem:[#allocation2 + $0xd4] sm:$0xf] }
 0x101   :  { %2225 = vmatmul.bf16.gmra.mxu0 %v2808_v8  ;;  %1555 = vrot.lane.b32.xlu2 %v1492_v47, %s3093_s29  ;;  %v1267_v37 = vor.u32 %v1266_v41, %v1263_v40  ;;  %v2889_v22 = vld [vmem:[#allocation2 + $0xd8] sm:$0xf0] }
 0x102   :  { %v1542_v29 = vpop.permute.xlu1 %1541  ;;  %v2892_v15 = vor.u32 %v3023_v58, %v2889_v22  ;;  %v38_v22 = vld [vmem:[%s4793_s0 + $0x4c] sm:$0xf] }
 0x103   :  { %895 = vrot.lane.b32.xlu0 %v808_v16, %s3091_s19  ;;  %1614 = vst.msk [vmem:[#allocation2 + $0xc0] sm:$0xf] %vm1589_vm0, %v1542_v29  ;;  %v882_v62 = vpop.permute.xlu2 %881  ;;  %v1268_v24 = vsel %vm3237_vm13, %v1259_v13, %v1267_v37  ;;  %v53_v16 = vld [vmem:[%s4793_s0 + $0xa8] sm:$0xf] }
 0x104   :  { %v4532_v34 = vpop.f32.mrf.mxu1  ;;  %2962 = vmatmul.msk.bf16.gmra.mxu2 %vm2153_vm10, %v2892_v15  ;;  %86 = vst.msk [vmem:[#allocation2 + $0xe0] sm:$0xf] %vm57_vm6, %v53_v16 }
 0x105   :  { %v916_v63 = vpop.permute.xlu0 %915  ;;  %71 = vst.msk [vmem:[#allocation2 + $0x68] sm:$0xf] %vm57_vm6, %v38_v22 }
 0x106   :  { %987 = vst.msk [vmem:[#allocation2 + $0xc8] sm:$0xf] %vm961_vm15, %v916_v63 }
 0x107   :  { %1615 = vst.msk [vmem:[#allocation2 + $0xc8] sm:$0xf] %vm1589_vm0, %v1544_v10 }
 0x109   :  { %893 = vrot.lane.b32.xlu2 %v805_v51, %s3091_s19  ;;  %v1666_v51 = vld [vmem:[%s4793_s0 + $0xb0] sm:$0x3] }
 0x10a   :  { %v544_v52 = vpop.permute.xlu1 %543  ;;  %v2879_v53 = vld [vmem:[#allocation2 + $0xc0] sm:$0xf] }
 0x10b   :  { %631 = vst.msk [vmem:[#allocation2 + $0x48] sm:$0xf] %vm621_vm14, %v544_v52  ;;  %v1512_v54 = vpop.permute.xlu2 %1511  ;;  %v1824_v52 = vrot.slane %v1666_v51, 6 }
 0x10c   :  { %v4547_v19 = vpop.f32.mrf.mxu1 }
 0x10d   :  { %v542_v38 = vpop.permute.xlu0 %541 }
 0x10e   :  { %630 = vst.msk [vmem:[#allocation2 + $0x40] sm:$0xf] %vm621_vm14, %v542_v38  ;;  %v3022_v48 = vld [vmem:[#allocation2 + $0xc4] sm:$0xf0] }
 0x10f   :  { %970 = vst.msk [vmem:[#allocation2 + $0x40] sm:$0xf] %vm961_vm15, %v882_v62  ;;  %v2880_v59 = vor.u32 %v3022_v48, %v2879_v53  ;;  %v1822_v53 = vsel %vm3181_vm9, %v2779_v45, %v1821_v25 }
 0x110   :  { %1893 = vst.msk [vmem:[#allocation2 + $0xe4] sm:$0xf] %vm57_vm6, %v1822_v53 }
 0x111   :  { %2270 = vmatmul.bf16.gmra.mxu3 %v2880_v59  ;;  %1523 = vrot.lane.b32.xlu2 %v1268_v24, %s3093_s29  ;;  %v37_v24 = vld [vmem:[%s4793_s0 + $0x48] sm:$0xf]  ;;  %s2737_s29 = sshll.u32 %s4799_s6, 4  ;;  %s2738_s29 = int_to_ptr.hbm [resolvable:$true] %s2737_s29 }
 0x112   :  { %v1510_v33 = vpop.permute.xlu1 %1509  ;;  %70 = vst.msk [vmem:[#allocation2 + $0x60] sm:$0xf] %vm57_vm6, %v37_v24 }
 0x113   :  { %1598 = vst.msk [vmem:[#allocation2 + $0x40] sm:$0xf] %vm1589_vm0, %v1510_v33  ;;  %v918_v6 = vpop.permute.xlu2 %917 }
 0x114   :  { %v2340_v18 = vpop.f32.mrf.mxu1 }
 0x115   :  { %v884_v61 = vpop.permute.xlu0 %883  ;;  %v2251_v10 = vpop.f32.mrf.mxu3 }
 0x116   :  { %971 = vst.msk [vmem:[#allocation2 + $0x48] sm:$0xf] %vm961_vm15, %v884_v61  ;;  %v2341_v7 = vadd.f32 %v2340_v18, %v2251_v10 }
 0x117   :  { %1599 = vst.msk [vmem:[#allocation2 + $0x48] sm:$0xf] %vm1589_vm0, %v1512_v54  ;;  %v1825_v54 = vsel %vm3181_vm9, %v1823_v27, %v1824_v52  ;;  %v3025_v33 = vld [vmem:[#allocation2 + $0xe4] sm:$0xf] }
 0x118   :  { %v2398_v12 = vadd.f32 %v4570_v28, %v2341_v7  ;;  %1894 = vst.msk [vmem:[#allocation2 + $0xec] sm:$0xf] %vm57_vm6, %v1825_v54 }
 0x11a   :  { %v580_v4 = vpop.permute.xlu1 %579  ;;  %v2815_v39 = vld [vmem:[#allocation2 + $0x40] sm:$0xf] }
 0x11b   :  { %649 = vst.msk [vmem:[#allocation2 + $0xd8] sm:$0xf] %vm621_vm14, %v580_v4  ;;  %v1548_v9 = vpop.permute.xlu2 %1547 }
 0x11c   :  { %v2342_v23 = vpop.f32.mrf.mxu1 }
 0x11d   :  { %v578_v8 = vpop.permute.xlu0 %577  ;;  %v2253_v47 = vpop.f32.mrf.mxu3 }
 0x11e   :  { %648 = vst.msk [vmem:[#allocation2 + $0xd0] sm:$0xf] %vm621_vm14, %v578_v8  ;;  %v2211_v29 = vpop.f32.mrf.mxu0  ;;  %v3006_v3 = vld [vmem:[#allocation2 + $0x44] sm:$0xf0]  ;;  %v2343_v56 = vadd.f32 %v2342_v23, %v2253_v47 }
 0x11f   :  { %988 = vst.msk [vmem:[#allocation2 + $0xd0] sm:$0xf] %vm961_vm15, %v918_v6  ;;  %v2816_v21 = vor.u32 %v3006_v3, %v2815_v39  ;;  %v2301_v40 = vadd.f32 %v3940_v42, %v2211_v29  ;;  %v2345_v6 = vpop.f32.mrf.mxu2  ;;  %v2897_v61 = vld [vmem:[#allocation2 + $0xe8] sm:$0xf0] }
 0x120   :  { %v2399_v62 = vadd.f32 %v4575_v2, %v2343_v56  ;;  %v2900_v10 = vor.u32 %v3025_v33, %v2897_v61 }
 0x121   :  { %2230 = vmatmul.bf16.gmra.mxu0 %v2816_v21  ;;  %v2382_v42 = vadd.f32 %v4570_v28, %v2301_v40 }
 0x122   :  { %v1546_v5 = vpop.permute.xlu1 %1545  ;;  %v2470_v63 = vmax.f32 %v2398_v12, %v2399_v62  ;;  %2963 = vmatmul.msk.bf16.gmra.mxu2 %vm2153_vm10, %v2900_v10 }
 0x123   :  { %1616 = vst.msk [vmem:[#allocation2 + $0xd0] sm:$0xf] %vm1589_vm0, %v1546_v5  ;;  %v886_v43 = vpop.permute.xlu2 %885  ;;  %v55_v5 = vld [vmem:[%s4793_s0 + $0xb4] sm:$0xf] }
 0x124   :  { %v2471_v18 = vrot.slane %v2470_v63, 4  ;;  %88 = vst.msk [vmem:[#allocation2 + $0xf0] sm:$0xf] %vm57_vm6, %v55_v5 }
 0x125   :  { %v920_v41 = vpop.permute.xlu0 %919 }
 0x126   :  { %989 = vst.msk [vmem:[#allocation2 + $0xd8] sm:$0xf] %vm961_vm15, %v920_v41  ;;  %v2213_v13 = vpop.f32.mrf.mxu0  ;;  %v2472_v47 = vmax.f32 %v2470_v63, %v2471_v18 }
 0x127   :  { %1617 = vst.msk [vmem:[#allocation2 + $0xd8] sm:$0xf] %vm1589_vm0, %v1548_v9  ;;  %v2303_v37 = vadd.f32 %v3983_v17, %v2213_v13  ;;  %v2347_v23 = vpop.f32.mrf.mxu2  ;;  %v1668_v13 = vld [vmem:[%s4793_s0 + $0xb8] sm:$0xf] }
 0x128   :  { %v2473_v16 = vrot.slane %v2472_v47, 2  ;;  %v1828_v53 = vrot.slane %v1668_v13, 6 }
 0x129   :  { %v2383_v38 = vadd.f32 %v4575_v2, %v2303_v37 }
 0x12a   :  { %v548_v57 = vpop.permute.xlu1 %547  ;;  %v2887_v44 = vld [vmem:[#allocation2 + $0xd0] sm:$0xf]  ;;  %v2474_v30 = vmax.f32 %v2472_v47, %v2473_v16  ;;  %v1830_v24 = vrot.slane %v1828_v53, 4 }
 0x12b   :  { %v2414_v48 = vmax.f32 %v2382_v42, %v2383_v38  ;;  %633 = vst.msk [vmem:[#allocation2 + $0x58] sm:$0xf] %vm621_vm14, %v548_v57  ;;  %v1516_v17 = vpop.permute.xlu2 %1515  ;;  %v1667_v57 = vld [vmem:[%s4793_s0 + $0xb4] sm:$0xc] }
 0x12c   :  { %v2475_v27 = vrot.slane %v2474_v30, 1 }
 0x12d   :  { %v546_v59 = vpop.permute.xlu0 %545  ;;  %v2415_v3 = vrot.slane %v2414_v48, 4 }
 0x12e   :  { %632 = vst.msk [vmem:[#allocation2 + $0x50] sm:$0xf] %vm621_vm14, %v546_v59  ;;  %v3024_v58 = vld [vmem:[#allocation2 + $0xd4] sm:$0xf0]  ;;  %v2780_v59 = vrot.slane %v1667_v57, 10  ;;  %v2476_v22 = vmax.f32 %v2474_v30, %v2475_v27 }
 0x12f   :  { %972 = vst.msk [vmem:[#allocation2 + $0x50] sm:$0xf] %vm961_vm15, %v886_v43  ;;  %v2888_v15 = vor.u32 %v3024_v58, %v2887_v44  ;;  %v56_v43 = vld [vmem:[%s4793_s0 + $0xb8] sm:$0xf]  ;;  %v2416_v41 = vmax.f32 %v2414_v48, %v2415_v3  ;;  %v1669_v48 = vld [vmem:[%s4793_s0 + $0xbc] sm:$0x3] }
 0x130   :  { %89 = vst.msk [vmem:[#allocation2 + $0xf8] sm:$0xf] %vm57_vm6, %v56_v43  ;;  %v1831_v58 = vrot.slane %v1669_v48, 6  ;;  %v1829_v61 = vsel %vm3181_vm9, %v2780_v59, %v1828_v53 }
 0x131   :  { %2275 = vmatmul.bf16.gmra.mxu3 %v2888_v15  ;;  %v2417_v54 = vrot.slane %v2416_v41, 2  ;;  %1895 = vst.msk [vmem:[#allocation2 + $0xf4] sm:$0xf] %vm57_vm6, %v1829_v61  ;;  %v2350_v43 = vpop.f32.mrf.mxu2 }
 0x132   :  { %v1514_v4 = vpop.permute.xlu1 %1513  ;;  %v1832_v10 = vsel %vm3181_vm9, %v1830_v24, %v1831_v58 }
 0x133   :  { %1600 = vst.msk [vmem:[#allocation2 + $0x50] sm:$0xf] %vm1589_vm0, %v1514_v4  ;;  %v922_v9 = vpop.permute.xlu2 %921  ;;  %v2418_v18 = vmax.f32 %v2416_v41, %v2417_v54 }
 0x134   :  { %v2256_v39 = vpop.f32.mrf.mxu3  ;;  %1896 = vst.msk [vmem:[#allocation2 + $0xfc] sm:$0xf] %vm57_vm6, %v1832_v10 }
 0x135   :  { %v2346_v7 = vadd.f32 %v2345_v6, %v2256_v39  ;;  %v888_v8 = vpop.permute.xlu0 %887 }
 0x136   :  { %973 = vst.msk [vmem:[#allocation2 + $0x58] sm:$0xf] %vm961_vm15, %v888_v8 }
 0x137   :  { %1601 = vst.msk [vmem:[#allocation2 + $0x58] sm:$0xf] %vm1589_vm0, %v1516_v17  ;;  %v2400_v14 = vadd.f32 %v4570_v28, %v2346_v7 }
 0x13a   :  { %v584_v29 = vpop.permute.xlu1 %583  ;;  %v2823_v56 = vld [vmem:[#allocation2 + $0x50] sm:$0xf] }
 0x13b   :  { %651 = vst.msk [vmem:[#allocation2 + $0xe8] sm:$0xf] %vm621_vm14, %v584_v29  ;;  %v1552_v21 = vpop.permute.xlu2 %1551 }
 0x13c   :  { %v2258_v35 = vpop.f32.mrf.mxu3 }
 0x13d   :  { %v2348_v12 = vadd.f32 %v2347_v23, %v2258_v35  ;;  %v582_v62 = vpop.permute.xlu0 %581  ;;  %v2419_v23 = vrot.slane %v2418_v18, 1 }
 0x13e   :  { %650 = vst.msk [vmem:[#allocation2 + $0xe0] sm:$0xf] %vm621_vm14, %v582_v62  ;;  %v2216_v63 = vpop.f32.mrf.mxu0  ;;  %v3008_v25 = vld [vmem:[#allocation2 + $0x54] sm:$0xf0] }
 0x13f   :  { %v2401_v51 = vadd.f32 %v4575_v2, %v2348_v12  ;;  %990 = vst.msk [vmem:[#allocation2 + $0xe0] sm:$0xf] %vm961_vm15, %v922_v9  ;;  %v2824_v40 = vor.u32 %v3008_v25, %v2823_v56  ;;  %v2306_v42 = vadd.f32 %v4029_v60, %v2216_v63  ;;  %v4654_v60 = vld [vmem:[%s4795_s2] ss:$0 sm:$0xff]  ;;  %v39_v56 = vld [vmem:[%s4793_s0 + $0x54] sm:$0xf] }
 0x140   :  { %v2538_v8 = vadd.f32 %v4654_v60, %v2476_v22  ;;  %v40_v12 = vld [vmem:[%s4793_s0 + $0x58] sm:$0xf]  ;;  %v3027_v25 = vld [vmem:[#allocation2 + $0xf4] sm:$0xf]  ;;  %72 = vst.msk [vmem:[#allocation2 + $0x70] sm:$0xf] %vm57_vm6, %v39_v56 }
 0x141   :  { %v2477_v45 = vmax.f32 %v2400_v14, %v2401_v51  ;;  %2235 = vmatmul.bf16.gmra.mxu0 %v2824_v40  ;;  %v2384_v39 = vadd.f32 %v4570_v28, %v2306_v42  ;;  %v2905_v14 = vld [vmem:[#allocation2 + $0xf8] sm:$0xf0]  ;;  %v2420_v51 = vmax.f32 %v2418_v18, %v2419_v23  ;;  %73 = vst.msk [vmem:[#allocation2 + $0x78] sm:$0xf] %vm57_vm6, %v40_v12  ;;  %vm2646_vm6 = vcmask 1046534  }
 0x142   :  { %v1550_v52 = vpop.permute.xlu1 %1549  ;;  %v2554_v62 = vmax.f32 %v2538_v8, 0.0 }
 0x143   :  { %v2478_v37 = vrot.slane %v2477_v45, 4  ;;  %1618 = vst.msk [vmem:[#allocation2 + $0xe0] sm:$0xf] %vm1589_vm0, %v1550_v52  ;;  %v890_v38 = vpop.permute.xlu2 %889  ;;  %v2530_v54 = vadd.f32 %v4654_v60, %v2420_v51 }
 0x144   :  { %v2570_v52 = vpack.c.bf16 %v2554_v62, %v2554_v62 }
 0x145   :  { %v2479_v44 = vmax.f32 %v2477_v45, %v2478_v37  ;;  %v924_v17 = vpop.permute.xlu0 %923  ;;  %v2908_v45 = vor.u32 %v3027_v25, %v2905_v14  ;;  %v2546_v58 = vmax.f32 %v2530_v54, 0.0 }
 0x146   :  { %991 = vst.msk [vmem:[#allocation2 + $0xe8] sm:$0xf] %vm961_vm15, %v924_v17  ;;  %v2218_v15 = vpop.f32.mrf.mxu0  ;;  %v2622_v17 = vunpack.c.l.b16 %v2570_v52 }
 0x147   :  { %v2480_v33 = vrot.slane %v2479_v44, 2  ;;  %1619 = vst.msk [vmem:[#allocation2 + $0xe8] sm:$0xf] %vm1589_vm0, %v1552_v21  ;;  %v2308_v6 = vadd.f32 %v4077_v11, %v2218_v15  ;;  %2964 = vmatmul.msk.bf16.gmra.mxu2 %vm2153_vm10, %v2908_v45 }
 0x149   :  { %v2481_v4 = vmax.f32 %v2479_v44, %v2480_v33  ;;  %v2385_v9 = vadd.f32 %v4575_v2, %v2308_v6  ;;  %v2352_v33 = vpop.f32.mrf.mxu2 }
 0x14a   :  { %v552_v7 = vpop.permute.xlu1 %551  ;;  %v2895_v16 = vld [vmem:[#allocation2 + $0xe0] sm:$0xf] }
 0x14b   :  { %v2482_v11 = vrot.slane %v2481_v4, 1  ;;  %v2421_v47 = vmax.f32 %v2384_v39, %v2385_v9  ;;  %635 = vst.msk [vmem:[#allocation2 + $0x68] sm:$0xf] %vm621_vm14, %v552_v7  ;;  %v1520_v32 = vpop.permute.xlu2 %1519 }
 0x14d   :  { %v2483_v29 = vmax.f32 %v2481_v4, %v2482_v11  ;;  %v2422_v3 = vrot.slane %v2421_v47, 4  ;;  %v550_v35 = vpop.permute.xlu0 %549  ;;  %v2562_v4 = vpack.c.bf16 %v2546_v58, %v2546_v58 }
 0x14e   :  { %634 = vst.msk [vmem:[#allocation2 + $0x60] sm:$0xf] %vm621_vm14, %v550_v35  ;;  %v3026_v21 = vld [vmem:[#allocation2 + $0xe4] sm:$0xf0] }
 0x14f   :  { %v2539_v5 = vadd.f32 %v4654_v60, %v2483_v29  ;;  %v2423_v30 = vmax.f32 %v2421_v47, %v2422_v3  ;;  %974 = vst.msk [vmem:[#allocation2 + $0x60] sm:$0xf] %vm961_vm15, %v890_v38  ;;  %v2896_v63 = vor.u32 %v3026_v21, %v2895_v16  ;;  %v2614_v3 = vunpack.c.l.b16 %v2562_v4 }
 0x151   :  { %v2555_v40 = vmax.f32 %v2539_v5, 0.0  ;;  %v2424_v41 = vrot.slane %v2423_v30, 2  ;;  %2280 = vmatmul.bf16.gmra.mxu3 %v2896_v63 }
 0x152   :  { %v1518_v27 = vpop.permute.xlu1 %1517 }
 0x153   :  { %v2571_v13 = vpack.c.bf16 %v2555_v40, %v2555_v40  ;;  %v2425_v37 = vmax.f32 %v2423_v30, %v2424_v41  ;;  %1602 = vst.msk [vmem:[#allocation2 + $0x60] sm:$0xf] %vm1589_vm0, %v1518_v27  ;;  %v926_v44 = vpop.permute.xlu2 %925 }
 0x154   :  { %v2261_v53 = vpop.f32.mrf.mxu3 }
 0x155   :  { %v2623_v42 = vunpack.c.l.b16 %v2571_v13  ;;  %v2426_v38 = vrot.slane %v2425_v37, 1  ;;  %v2351_v57 = vadd.f32 %v2350_v43, %v2261_v53  ;;  %v892_v48 = vpop.permute.xlu0 %891 }
 0x156   :  { %975 = vst.msk [vmem:[#allocation2 + $0x68] sm:$0xf] %vm961_vm15, %v892_v48  ;;  %v2355_v48 = vpop.f32.mrf.mxu2 }
 0x157   :  { %v2651_v59 = vrot.slane %v2623_v42, 7  ;;  %v2427_v24 = vmax.f32 %v2425_v37, %v2426_v38  ;;  %1603 = vst.msk [vmem:[#allocation2 + $0x68] sm:$0xf] %vm1589_vm0, %v1520_v32  ;;  %v2402_v16 = vadd.f32 %v4570_v28, %v2351_v57 }
 0x159   :  { %v2531_v22 = vadd.f32 %v4654_v60, %v2427_v24  ;;  %v4686_v15 = vsel %vm2631_vm1, %v2651_v59, %v2622_v17 }
 0x15a   :  { %v588_v6 = vpop.permute.xlu1 %587  ;;  %v2831_v18 = vld [vmem:[#allocation2 + $0x60] sm:$0xf] }
 0x15b   :  { %v2547_v61 = vmax.f32 %v2531_v22, 0.0  ;;  %653 = vst.msk [vmem:[#allocation2 + $0xf8] sm:$0xf] %vm621_vm14, %v588_v6  ;;  %v1556_v29 = vpop.permute.xlu2 %1555 }
 0x15c   :  { %v2263_v10 = vpop.f32.mrf.mxu3 }
 0x15d   :  { %v2563_v39 = vpack.c.bf16 %v2547_v61, %v2547_v61  ;;  %v2353_v9 = vadd.f32 %v2352_v33, %v2263_v10  ;;  %v586_v7 = vpop.permute.xlu0 %585 }
 0x15e   :  { %652 = vst.msk [vmem:[#allocation2 + $0xf0] sm:$0xf] %vm621_vm14, %v586_v7  ;;  %v2221_v8 = vpop.f32.mrf.mxu0  ;;  %v3010_v11 = vld [vmem:[#allocation2 + $0x64] sm:$0xf0] }
 0x15f   :  { %v2615_v47 = vunpack.c.l.b16 %v2563_v39  ;;  %v2403_v32 = vadd.f32 %v4575_v2, %v2353_v9  ;;  %992 = vst.msk [vmem:[#allocation2 + $0xf0] sm:$0xf] %vm961_vm15, %v926_v44  ;;  %v2832_v23 = vor.u32 %v3010_v11, %v2831_v18  ;;  %v2311_v30 = vadd.f32 %v4124_v49, %v2221_v8  ;;  %v2357_v8 = vpop.f32.mrf.mxu2 }
 0x161   :  { %v2630_v35 = vrot.slane %v2615_v47, 7  ;;  %v2484_v56 = vmax.f32 %v2402_v16, %v2403_v32  ;;  %2240 = vmatmul.bf16.gmra.mxu0 %v2832_v23  ;;  %v2386_v40 = vadd.f32 %v4570_v28, %v2311_v30 }
 0x162   :  { %v1554_v21 = vpop.permute.xlu1 %1553 }
 0x163   :  { %v2485_v12 = vrot.slane %v2484_v56, 4  ;;  %1620 = vst.msk [vmem:[#allocation2 + $0xf0] sm:$0xf] %vm1589_vm0, %v1554_v21  ;;  %v4695_v62 = vsel %vm2631_vm1, %v2630_v35, %v2614_v3  ;;  %v894_v45 = vpop.permute.xlu2 %893 }
 0x165   :  { %v2486_v5 = vmax.f32 %v2484_v56, %v2485_v12  ;;  %v928_v63 = vpop.permute.xlu0 %927 }
 0x166   :  { %993 = vst.msk [vmem:[#allocation2 + $0xf8] sm:$0xf] %vm961_vm15, %v928_v63  ;;  %v2223_v25 = vpop.f32.mrf.mxu0 }
 0x167   :  { %v2487_v43 = vrot.slane %v2486_v5, 2  ;;  %1621 = vst.msk [vmem:[#allocation2 + $0xf8] sm:$0xf] %vm1589_vm0, %v1556_v29  ;;  %v2313_v14 = vadd.f32 %v4165_v50, %v2223_v25 }
 0x169   :  { %v2488_v51 = vmax.f32 %v2486_v5, %v2487_v43  ;;  %v2387_v41 = vadd.f32 %v4575_v2, %v2313_v14 }
 0x16a   :  { %v556_v27 = vpop.permute.xlu1 %555  ;;  %v2903_v49 = vld [vmem:[#allocation2 + $0xf0] sm:$0xf] }
 0x16b   :  { %v2489_v52 = vrot.slane %v2488_v51, 1  ;;  %v2428_v13 = vmax.f32 %v2386_v40, %v2387_v41  ;;  %637 = vst.msk [vmem:[#allocation2 + $0x78] sm:$0xf] %vm621_vm14, %v556_v27  ;;  %v1524_v33 = vpop.permute.xlu2 %1523 }
 0x16d   :  { %v2490_v37 = vmax.f32 %v2488_v51, %v2489_v52  ;;  %v2429_v53 = vrot.slane %v2428_v13, 4  ;;  %v554_v54 = vpop.permute.xlu0 %553 }
 0x16e   :  { %636 = vst.msk [vmem:[#allocation2 + $0x70] sm:$0xf] %vm621_vm14, %v554_v54  ;;  %v3028_v42 = vld [vmem:[#allocation2 + $0xf4] sm:$0xf0] }
 0x16f   :  { %v2540_v50 = vadd.f32 %v4654_v60, %v2490_v37  ;;  %v2430_v38 = vmax.f32 %v2428_v13, %v2429_v53  ;;  %976 = vst.msk [vmem:[#allocation2 + $0x70] sm:$0xf] %vm961_vm15, %v894_v45  ;;  %v2904_v57 = vor.u32 %v3028_v42, %v2903_v49 }
 0x171   :  { %v2556_v44 = vmax.f32 %v2540_v50, 0.0  ;;  %v2431_v17 = vrot.slane %v2430_v38, 2  ;;  %2285 = vmatmul.bf16.gmra.mxu3 %v2904_v57 }
 0x172   :  { %v1522_v59 = vpop.permute.xlu1 %1521 }
 0x173   :  { %v2572_v24 = vpack.c.bf16 %v2556_v44, %v2556_v44  ;;  %v2432_v58 = vmax.f32 %v2430_v38, %v2431_v17  ;;  %1604 = vst.msk [vmem:[#allocation2 + $0x70] sm:$0xf] %vm1589_vm0, %v1522_v59 }
 0x174   :  { %v2266_v22 = vpop.f32.mrf.mxu3 }
 0x175   :  { %v2624_v6 = vunpack.c.l.b16 %v2572_v24  ;;  %v2433_v61 = vrot.slane %v2432_v58, 1  ;;  %v2356_v10 = vadd.f32 %v2355_v48, %v2266_v22  ;;  %v896_v18 = vpop.permute.xlu0 %895 }
 0x176   :  { %977 = vst.msk [vmem:[#allocation2 + $0x78] sm:$0xf] %vm961_vm15, %v896_v18 }
 0x177   :  { %v2653_v4 = vrot.slane %v2624_v6, 6  ;;  %v2434_v39 = vmax.f32 %v2432_v58, %v2433_v61  ;;  %1605 = vst.msk [vmem:[#allocation2 + $0x78] sm:$0xf] %vm1589_vm0, %v1524_v33  ;;  %v2404_v56 = vadd.f32 %v4570_v28, %v2356_v10  ;;  %v3046_v6 = vld [vmem:[%s4797_s4 + $0x38] sm:$0xff] }
 0x178   :  { %2715 = vmatpush.bf16.msrb.mxu2 %v3046_v6 }
 0x179   :  { %v2532_v9 = vadd.f32 %v4654_v60, %v2434_v39  ;;  %v2654_v7 = vsel %vm2634_vm2, %v2653_v4, %v4686_v15 }
 0x17a   :  { %v2839_v16 = vld [vmem:[#allocation2 + $0x70] sm:$0xf] }
 0x17b   :  { %v2548_v11 = vmax.f32 %v2532_v9, 0.0 }
 0x17c   :  { %v2268_v47 = vpop.f32.mrf.mxu3 }
 0x17d   :  { %v2564_v32 = vpack.c.bf16 %v2548_v11, %v2548_v11  ;;  %v2358_v23 = vadd.f32 %v2357_v8, %v2268_v47 }
 0x17e   :  { %v2226_v29 = vpop.f32.mrf.mxu0  ;;  %v3012_v3 = vld [vmem:[#allocation2 + $0x74] sm:$0xf0] }
 0x17f   :  { %v2616_v35 = vunpack.c.l.b16 %v2564_v32  ;;  %v2405_v21 = vadd.f32 %v4575_v2, %v2358_v23  ;;  %v2840_v12 = vor.u32 %v3012_v3, %v2839_v16  ;;  %v2316_v43 = vadd.f32 %v4216_v36, %v2226_v29  ;;  %v3045_v23 = vld [vmem:[%s4797_s4 + $0x30] sm:$0xff] }
 0x180   :  { %2716 = vmatpush.bf16.msrb.mxu2 %v3045_v23 }
 0x181   :  { %v2633_v5 = vrot.slane %v2616_v35, 6  ;;  %v2491_v30 = vmax.f32 %v2404_v56, %v2405_v21  ;;  %2245 = vmatmul.bf16.gmra.mxu0 %v2840_v12  ;;  %v2388_v45 = vadd.f32 %v4570_v28, %v2316_v43  ;;  %v3044_v12 = vld [vmem:[%s4797_s4 + $0x28] sm:$0xff] }
 0x183   :  { %v2492_v63 = vrot.slane %v2491_v30, 4  ;;  %v2635_v15 = vsel %vm2634_vm2, %v2633_v5, %v4695_v62 }
 0x184   :  { %2717 = vmatpush.bf16.msrb.mxu2 %v3044_v12 }
 0x185   :  { %v2493_v25 = vmax.f32 %v2491_v30, %v2492_v63 }
 0x186   :  { %v2228_v14 = vpop.f32.mrf.mxu0 }
 0x187   :  { %v2494_v51 = vrot.slane %v2493_v25, 2  ;;  %v2318_v40 = vadd.f32 %v4265_v31, %v2228_v14 }
 0x189   :  { %v2495_v41 = vmax.f32 %v2493_v25, %v2494_v51  ;;  %v2389_v27 = vadd.f32 %v4575_v2, %v2318_v40  ;;  %v3043_v51 = vld [vmem:[%s4797_s4 + $0x20] sm:$0xff] }
 0x18a   :  { %2718 = vmatpush.bf16.msrb.mxu2 %v3043_v51 }
 0x18b   :  { %v2496_v52 = vrot.slane %v2495_v41, 1  ;;  %v2435_v13 = vmax.f32 %v2388_v45, %v2389_v27  ;;  %v3042_v27 = vld [vmem:[%s4797_s4 + $0x18] sm:$0xff] }
 0x18d   :  { %v2497_v49 = vmax.f32 %v2495_v41, %v2496_v52  ;;  %v2436_v37 = vrot.slane %v2435_v13, 4 }
 0x18e   :  { %2719 = vmatpush.bf16.msrb.mxu2 %v3042_v27 }
 0x18f   :  { %v2541_v53 = vadd.f32 %v4654_v60, %v2497_v49  ;;  %v2437_v54 = vmax.f32 %v2435_v13, %v2436_v37 }
 0x191   :  { %v2557_v62 = vmax.f32 %v2541_v53, 0.0  ;;  %v2438_v42 = vrot.slane %v2437_v54, 2 }
 0x193   :  { %v2573_v50 = vpack.c.bf16 %v2557_v62, %v2557_v62  ;;  %v2439_v36 = vmax.f32 %v2437_v54, %v2438_v42 }
 0x194   :  { %v2271_v3 = vpop.f32.mrf.mxu3 }
 0x195   :  { %v2625_v38 = vunpack.c.l.b16 %v2573_v50  ;;  %v2440_v57 = vrot.slane %v2439_v36, 1 }
 0x197   :  { %v2655_v31 = vrot.slane %v2625_v38, 5  ;;  %v2441_v48 = vmax.f32 %v2439_v36, %v2440_v57 }
 0x199   :  { %v2533_v44 = vadd.f32 %v4654_v60, %v2441_v48  ;;  %v4723_v17 = vsel %vm2637_vm3, %v2655_v31, %v2654_v7 }
 0x19b   :  { %v2549_v59 = vmax.f32 %v2533_v44, 0.0 }
 0x19c   :  { %v2273_v63 = vpop.f32.mrf.mxu3 }
 0x19d   :  { %v2565_v24 = vpack.c.bf16 %v2549_v59, %v2549_v59 }
 0x19e   :  { %v2231_v58 = vpop.f32.mrf.mxu0 }
 0x19f   :  { %v2617_v22 = vunpack.c.l.b16 %v2565_v24  ;;  %v2321_v10 = vadd.f32 %v4302_v0, %v2231_v58  ;;  %v2360_v0 = vpop.f32.mrf.mxu2 }
 0x1a0   :  { %v2361_v36 = vadd.f32 %v2360_v0, %v2271_v3  ;;  %v3040_v0 = vld [vmem:[%s4797_s4 + $0x8] sm:$0xff] }
 0x1a1   :  { %v2636_v33 = vrot.slane %v2617_v22, 5  ;;  %v2390_v39 = vadd.f32 %v4570_v28, %v2321_v10 }
 0x1a3   :  { %v2638_v61 = vsel %vm2637_vm3, %v2636_v33, %v2635_v15  ;;  %v2406_v33 = vadd.f32 %v4570_v28, %v2361_v36 }
 0x1a6   :  { %v2233_v18 = vpop.f32.mrf.mxu0 }
 0x1a7   :  { %v2323_v4 = vadd.f32 %v4343_v46, %v2233_v18  ;;  %v2362_v30 = vpop.f32.mrf.mxu2 }
 0x1a8   :  { %v2363_v62 = vadd.f32 %v2362_v30, %v2273_v63 }
 0x1a9   :  { %v2391_v9 = vadd.f32 %v4575_v2, %v2323_v4 }
 0x1aa   :  { %v2407_v44 = vadd.f32 %v4575_v2, %v2363_v62 }
 0x1ab   :  { %v2442_v7 = vmax.f32 %v2390_v39, %v2391_v9 }
 0x1ac   :  { %v2498_v10 = vmax.f32 %v2406_v33, %v2407_v44 }
 0x1ad   :  { %v2443_v8 = vrot.slane %v2442_v7, 4 }
 0x1af   :  { %v2444_v11 = vmax.f32 %v2442_v7, %v2443_v8  ;;  %v2365_v25 = vpop.f32.mrf.mxu2 }
 0x1b1   :  { %v2445_v47 = vrot.slane %v2444_v11, 2 }
 0x1b3   :  { %v2446_v16 = vmax.f32 %v2444_v11, %v2445_v47  ;;  %v2499_v11 = vrot.slane %v2498_v10, 4 }
 0x1b4   :  { %v2276_v43 = vpop.f32.mrf.mxu3 }
 0x1b5   :  { %v2447_v32 = vrot.slane %v2446_v16, 1  ;;  %v2366_v38 = vadd.f32 %v2365_v25, %v2276_v43  ;;  %v2500_v3 = vmax.f32 %v2498_v10, %v2499_v11 }
 0x1b7   :  { %v2448_v29 = vmax.f32 %v2446_v16, %v2447_v32  ;;  %v2367_v40 = vpop.f32.mrf.mxu2  ;;  %v2408_v6 = vadd.f32 %v4570_v28, %v2366_v38  ;;  %v2501_v63 = vrot.slane %v2500_v3, 2 }
 0x1b9   :  { %v2534_v46 = vadd.f32 %v4654_v60, %v2448_v29 }
 0x1bb   :  { %v2550_v35 = vmax.f32 %v2534_v46, 0.0 }
 0x1bc   :  { %v2278_v41 = vpop.f32.mrf.mxu3 }
 0x1bd   :  { %v2566_v56 = vpack.c.bf16 %v2550_v35, %v2550_v35  ;;  %v2368_v42 = vadd.f32 %v2367_v40, %v2278_v41 }
 0x1be   :  { %v2236_v14 = vpop.f32.mrf.mxu0 }
 0x1bf   :  { %v2618_v21 = vunpack.c.l.b16 %v2566_v56  ;;  %v2370_v52 = vpop.f32.mrf.mxu2  ;;  %v2326_v48 = vadd.f32 %v4395_v1, %v2236_v14  ;;  %v2409_v59 = vadd.f32 %v4575_v2, %v2368_v42  ;;  %v3039_v56 = vld [vmem:[%s4797_s4] sm:$0xff] }
 0x1c1   :  { %v2639_v5 = vrot.slane %v2618_v21, 4  ;;  %v2505_v18 = vmax.f32 %v2408_v6, %v2409_v59 }
 0x1c3   :  { %v4740_v15 = vsel %vm2640_vm4, %v2639_v5, %v2638_v61  ;;  %v2392_v61 = vadd.f32 %v4570_v28, %v2326_v48  ;;  %v2506_v47 = vrot.slane %v2505_v18, 4 }
 0x1c5   :  { %v2507_v46 = vmax.f32 %v2505_v18, %v2506_v47 }
 0x1c6   :  { %v2238_v45 = vpop.f32.mrf.mxu0 }
 0x1c7   :  { %v2372_v37 = vpop.f32.mrf.mxu2  ;;  %v2328_v50 = vadd.f32 %v4438_v55, %v2238_v45  ;;  %v3041_v55 = vld [vmem:[%s4797_s4 + $0x10] sm:$0xff]  ;;  %v2508_v25 = vrot.slane %v2507_v46, 2 }
 0x1c8   :  { %2720 = vmatpush.bf16.msrb.mxu2 %v3041_v55 }
 0x1c9   :  { %v2393_v22 = vadd.f32 %v4575_v2, %v2328_v50 }
 0x1cb   :  { %v2449_v9 = vmax.f32 %v2392_v61, %v2393_v22 }
 0x1cc   :  { %2721 = vmatpush.bf16.msrb.mxu2 %v3040_v0 }
 0x1cd   :  { %v2450_v32 = vrot.slane %v2449_v9, 4 }
 0x1cf   :  { %v2375_v39 = vpop.f32.mrf.mxu2  ;;  %v2451_v35 = vmax.f32 %v2449_v9, %v2450_v32 }
 0x1d0   :  { %2722 = vmatpush.bf16.msrb.mxu2 %v3039_v56 }
 0x1d1   :  { %v2452_v14 = vrot.slane %v2451_v35, 2 }
 0x1d4   :  { %v2281_v13 = vpop.f32.mrf.mxu3 }
 0x1d5   :  { %v2371_v24 = vadd.f32 %v2370_v52, %v2281_v13  ;;  %v2502_v13 = vmax.f32 %v2500_v3, %v2501_v63 }
 0x1d7   :  { %v2377_v5 = vpop.f32.mrf.mxu2  ;;  %v2503_v50 = vrot.slane %v2502_v13, 1 }
 0x1d9   :  { %v2504_v22 = vmax.f32 %v2502_v13, %v2503_v50 }
 0x1dc   :  { %v2283_v53 = vpop.f32.mrf.mxu3 }
 0x1dd   :  { %v2373_v57 = vadd.f32 %v2372_v37, %v2283_v53  ;;  %v2453_v37 = vmax.f32 %v2451_v35, %v2452_v14 }
 0x1de   :  { %v2241_v49 = vpop.f32.mrf.mxu0 }
 0x1df   :  { %v2331_v58 = vadd.f32 %v4468_v26, %v2241_v49  ;;  %v2410_v26 = vadd.f32 %v4570_v28, %v2371_v24  ;;  %v2509_v49 = vmax.f32 %v2507_v46, %v2508_v25  ;;  %v2454_v38 = vrot.slane %v2453_v37, 1 }
 0x1e1   :  { %v2394_v4 = vadd.f32 %v4570_v28, %v2331_v58  ;;  %v2510_v36 = vrot.slane %v2509_v49, 1  ;;  %v2455_v33 = vmax.f32 %v2453_v37, %v2454_v38 }
 0x1e3   :  { %v2511_v55 = vmax.f32 %v2509_v49, %v2510_v36 }
 0x1e6   :  { %v2243_v54 = vpop.f32.mrf.mxu0 }
 0x1e7   :  { %v2333_v31 = vadd.f32 %v4494_v20, %v2243_v54  ;;  %v2411_v20 = vadd.f32 %v4575_v2, %v2373_v57 }
 0x1e9   :  { %v2395_v1 = vadd.f32 %v4575_v2, %v2333_v31  ;;  %v2512_v7 = vmax.f32 %v2410_v26, %v2411_v20 }
 0x1eb   :  { %v2456_v8 = vmax.f32 %v2394_v4, %v2395_v1  ;;  %v2513_v23 = vrot.slane %v2512_v7, 4  ;;  %v2543_v4 = vadd.f32 %v4654_v60, %v2511_v55 }
 0x1ed   :  { %v2457_v29 = vrot.slane %v2456_v8, 4  ;;  %v2514_v21 = vmax.f32 %v2512_v7, %v2513_v23  ;;  %v2559_v47 = vmax.f32 %v2543_v4, 0.0 }
 0x1ef   :  { %v2458_v12 = vmax.f32 %v2456_v8, %v2457_v29  ;;  %v2515_v40 = vrot.slane %v2514_v21, 2  ;;  %v2575_v35 = vpack.c.bf16 %v2559_v47, %v2559_v47 }
 0x1f1   :  { %v2459_v41 = vrot.slane %v2458_v12, 2  ;;  %v2516_v54 = vmax.f32 %v2514_v21, %v2515_v40 }
 0x1f3   :  { %v2460_v62 = vmax.f32 %v2458_v12, %v2459_v41  ;;  %v2517_v48 = vrot.slane %v2516_v54, 1 }
 0x1f4   :  { %v2286_v16 = vpop.f32.mrf.mxu3 }
 0x1f5   :  { %v2376_v30 = vadd.f32 %v2375_v39, %v2286_v16  ;;  %v2461_v44 = vrot.slane %v2460_v62, 1  ;;  %v2518_v61 = vmax.f32 %v2516_v54, %v2517_v48  ;;  %v2535_v39 = vadd.f32 %v4654_v60, %v2455_v33 }
 0x1f7   :  { %v2412_v27 = vadd.f32 %v4570_v28, %v2376_v30  ;;  %v2462_v10 = vmax.f32 %v2460_v62, %v2461_v44  ;;  %v2544_v7 = vadd.f32 %v4654_v60, %v2518_v61  ;;  %v2551_v16 = vmax.f32 %v2535_v39, 0.0 }
 0x1f9   :  { %v2536_v8 = vadd.f32 %v4654_v60, %v2462_v10  ;;  %v2560_v23 = vmax.f32 %v2544_v7, 0.0  ;;  %v2567_v56 = vpack.c.bf16 %v2551_v16, %v2551_v16 }
 0x1fb   :  { %v2552_v29 = vmax.f32 %v2536_v8, 0.0  ;;  %v2619_v14 = vunpack.c.l.b16 %v2567_v56 }
 0x1fc   :  { %v2288_v43 = vpop.f32.mrf.mxu3 }
 0x1fd   :  { %v2378_v51 = vadd.f32 %v2377_v5, %v2288_v43  ;;  %v2568_v12 = vpack.c.bf16 %v2552_v29, %v2552_v29  ;;  %v2576_v5 = vpack.c.bf16 %v2560_v23, %v2560_v23  ;;  %v2627_v43 = vunpack.c.l.b16 %v2575_v35 }
 0x1fe   :  { %v2246_v45 = vpop.f32.mrf.mxu0  ;;  %v2642_v49 = vrot.slane %v2619_v14, 3 }
 0x1ff   :  { %v2413_v52 = vadd.f32 %v4575_v2, %v2378_v51  ;;  %v2336_v31 = vadd.f32 %v4532_v34, %v2246_v45  ;;  %v2542_v34 = vadd.f32 %v4654_v60, %v2504_v22  ;;  %v2620_v40 = vunpack.c.l.b16 %v2568_v12 }
 0x200   :  { %v2628_v41 = vunpack.c.l.b16 %v2576_v5  ;;  %v2659_v37 = vrot.slane %v2627_v43, 3 }
 0x201   :  { %v2519_v53 = vmax.f32 %v2412_v27, %v2413_v52  ;;  %v2396_v20 = vadd.f32 %v4570_v28, %v2336_v31 }
 0x202   :  { %v2661_v54 = vrot.slane %v2628_v41, 2 }
 0x203   :  { %v2520_v42 = vrot.slane %v2519_v53, 4 }
 0x205   :  { %v2521_v57 = vmax.f32 %v2519_v53, %v2520_v42  ;;  %v2645_v53 = vrot.slane %v2620_v40, 2 }
 0x206   :  { %v2248_v59 = vpop.f32.mrf.mxu0 }
 0x207   :  { %v2522_v24 = vrot.slane %v2521_v57, 2  ;;  %v2338_v58 = vadd.f32 %v4547_v19, %v2248_v59 }
 0x209   :  { %v2523_v6 = vmax.f32 %v2521_v57, %v2522_v24  ;;  %v2397_v1 = vadd.f32 %v4575_v2, %v2338_v58  ;;  %v2558_v2 = vmax.f32 %v2542_v34, 0.0  ;;  %v3064_v24 = vld [vmem:[%s4798_s5] ss:$0 sm:$0xff] }
 0x20b   :  { %v2524_v18 = vrot.slane %v2523_v6, 1  ;;  %v2463_v26 = vmax.f32 %v2396_v20, %v2397_v1  ;;  %v2574_v46 = vpack.c.bf16 %v2558_v2, %v2558_v2 }
 0x20d   :  { %v2525_v9 = vmax.f32 %v2523_v6, %v2524_v18  ;;  %v2464_v19 = vrot.slane %v2463_v26, 4  ;;  %v2626_v25 = vunpack.c.l.b16 %v2574_v46 }
 0x20f   :  { %v2465_v11 = vmax.f32 %v2463_v26, %v2464_v19  ;;  %v2545_v28 = vadd.f32 %v4654_v60, %v2525_v9  ;;  %v2657_v52 = vrot.slane %v2626_v25, 4 }
 0x211   :  { %v2466_v32 = vrot.slane %v2465_v11, 2  ;;  %v2561_v3 = vmax.f32 %v2545_v28, 0.0  ;;  %v2658_v50 = vsel %vm2640_vm4, %v2657_v52, %v4723_v17 }
 0x212   :  { %v2660_v38 = vsel %vm2643_vm5, %v2659_v37, %v2658_v50 }
 0x213   :  { %v2467_v0 = vmax.f32 %v2465_v11, %v2466_v32  ;;  %v2577_v63 = vpack.c.bf16 %v2561_v3, %v2561_v3  ;;  %v2662_v31 = vsel %vm2646_vm6, %v2661_v54, %v2660_v38 }
 0x215   :  { %v2468_v21 = vrot.slane %v2467_v0, 1  ;;  %v2629_v27 = vunpack.c.l.b16 %v2577_v63 }
 0x217   :  { %v2469_v30 = vmax.f32 %v2467_v0, %v2468_v21  ;;  %v2663_v42 = vrot.slane %v2629_v27, 1 }
 0x219   :  { %v2537_v51 = vadd.f32 %v4654_v60, %v2469_v30  ;;  %v2644_v60 = vsel %vm2643_vm5, %v2642_v49, %v4740_v15  ;;  %v2664_v44 = vsel %vm2649_vm7, %v2663_v42, %v2662_v31 }
 0x21a   :  { %v2647_v57 = vsel %vm2646_vm6, %v2645_v53, %v2644_v60 }
 0x21b   :  { %v2553_v45 = vmax.f32 %v2537_v51, 0.0 }
 0x21d   :  { %v2569_v13 = vpack.c.bf16 %v2553_v45, %v2553_v45 }
 0x21f   :  { %v2621_v62 = vunpack.c.l.b16 %v2569_v13 }
 0x221   :  { %v2648_v36 = vrot.slane %v2621_v62, 1 }
 0x223   :  { %v2650_v48 = vsel %vm2649_vm7, %v2648_v36, %v2647_v57 }
 0x224   :  { %v2665_v59 = vpack.c.b16 %v2664_v44, %v2650_v48 }
 0x226   :  { %2723 = vmatmul.bf16.vlgmr.msrb.gmra.mxu2 %v2665_v59 }
 0x2a9   :  { %v2724_v58 = vpop.f32.mrf.mxu2 }
 0x2aa   :  { %v2725_v22 = vadd.f32 %v3064_v24, %v2724_v58 }
 0x2ac   :  { %2729 = vst [vmem:[#allocation3] sm:$0xff] %v2725_v22 }
 0x2b1   :  { %v2726_v17 = vpop.f32.mrf.mxu2 }
 0x2b2   :  { %v2727_v15 = vadd.f32 %v3064_v24, %v2726_v17 }
 0x2b4   :  { %2730 = vst [vmem:[#allocation3 + $0x8] sm:$0xff] %v2727_v15 }
 0x2b5   :  { %2743 = dma.vmem_to_hbm [thread:$0]  %s2736_s25, 256, %s2738_s29, [#allocation4], %s3095_s28, %s3095_s28, %s3096_s1  }
 0x2b6   :  { %3089 = dma.done.wait [#allocation4], 256  }
 0x2b7   :  { %3090 = vsyncadd [#allocation4], 4294967040 }
 0x2b8   :  { %2748 = vsyncpa [#allocation4], 1 }

</bundles_post_ra>
